<compile_context>
chip_gen: v5e
topology: v5e:2x2
jax: 0.10.0
libtpu: 0.0.40
codegen_flags: <defaults>
</compile_context>

<pallas_src>
import math
import jax
import jax.numpy as jnp
from jax import lax
from jax.experimental import pallas as pl
from jax.experimental.pallas import tpu as pltpu


LANE = 128
_VMEM_LIMIT = 32 * 1024 * 1024


# ------------------------------------------------------------------ #
# helpers
# ------------------------------------------------------------------ #
def _round_up(x, m):
    return ((x + m - 1) // m) * m


def _pick_row_tile(h):
    for t in (8, 16, 32, 7, 6, 5, 4, 3):
        if h % t == 0:
            return t
    if h >= 3:
        return h
    raise ValueError("spatial height must be >= 3 for the fused conv kernel")


def _pick_q_tile(n):
    for t in (128, 64, 32, 16, 8):
        if n % t == 0:
            return t
    return n


# ------------------------------------------------------------------ #
# Pallas kernels
# ------------------------------------------------------------------ #
def _make_conv_kernel(twp, wp, cpad, add_pos):
    """3x3 conv (stride 1) + folded BN + ReLU (+ fused positional add).

    The halo window for TH output rows is assembled in a VMEM scratch from two
    adjacent row blocks of the spatially-padded, row-flattened input, and the
    conv becomes 9 accumulated (TH*Wp, Cin) @ (Cin, Cpad) tap matmuls (bf16
    inputs, f32 accumulation).  Output columns c >= W of every row are garbage
    and are sliced off by the wrapper.
    """
    def kernel(*refs):
        if add_pos:
            lo_ref, hi_ref, w_ref, s_ref, b_ref, pos_ref, o_ref, win_ref = refs
        else:
            lo_ref, hi_ref, w_ref, s_ref, b_ref, o_ref, win_ref = refs
            pos_ref = None

        # Assemble the 2*TH*Wp-row halo window in VMEM scratch.
        win_ref[pl.ds(0, twp), :] = lo_ref[0]
        win_ref[pl.ds(twp, twp), :] = hi_ref[0]

        acc = jnp.zeros((twp, cpad), jnp.float32)
        for dy in range(3):
            for dx in range(3):
                off = dy * wp + dx                              # static int
                tap = win_ref[pl.ds(off, twp), :]               # (TH*Wp, Cin) bf16
                acc = acc + jnp.dot(tap, w_ref[dy * 3 + dx],
                                    preferred_element_type=jnp.float32)

        y = jnp.maximum(acc * s_ref[...] + b_ref[...], 0.0)     # folded BN + ReLU (f32)
        if add_pos:
            y = y + pos_ref[0]                                  # fused `x += pos`
        o_ref[0] = y
    return kernel


def _make_attention_kernel(cpad):
    def kernel(xq_ref, xa_ref, wq_ref, bq_ref, wkv_ref, bkv_ref, g_ref, o_ref):
        xq = xq_ref[0]                                          # (TQ, Cpad) f32 (incl. pos)
        xa = xa_ref[0]                                          # (N,  Cpad) f32
        q = jnp.dot(xq.astype(jnp.bfloat16), wq_ref[...],
                    preferred_element_type=jnp.float32) + bq_ref[...]
        kv = jnp.dot(xa.astype(jnp.bfloat16), wkv_ref[...],
                     preferred_element_type=jnp.float32) + bkv_ref[...]
        k = kv[:, :cpad]
        v = kv[:, cpad:]
        # energy[i, j] = q[i] . k[j]
        e = lax.dot_general(q.astype(jnp.bfloat16), k.astype(jnp.bfloat16),
                            (((1,), (1,)), ((), ())),
                            preferred_element_type=jnp.float32)  # (TQ, N)
        e = e - jnp.max(e, axis=-1, keepdims=True)
        p = jnp.exp(e)
        denom = jnp.sum(p, axis=-1, keepdims=True)
        pv = jnp.dot(p.astype(jnp.bfloat16), v.astype(jnp.bfloat16),
                     preferred_element_type=jnp.float32)         # (TQ, Cpad)
        out = pv * pl.reciprocal(denom, approx=True)             # softmax norm folded post-PV
        o_ref[0] = g_ref[0, 0] * out + xq
    return kernel


# ------------------------------------------------------------------ #
# Wrappers around pallas_call
# ------------------------------------------------------------------ #
def conv3x3_bn_relu(x_nhwc, w_oihw, bn_scale, bn_bias, pos_nhwc=None, stride=1):
    """3x3 conv (pad=1) + folded BN + ReLU, NHWC in / NHWC out.

    Output channels are zero-padded to a multiple of 128 lanes and carried to
    the caller (lane-dense stores); the padded channels stay exactly zero.
    """
    B, H, W, Cin = x_nhwc.shape
    Cout, Cin_r = w_oihw.shape[0], w_oihw.shape[1]
    assert Cin >= Cin_r
    cpad = _round_up(Cout, LANE)

    th = _pick_row_tile(H)
    n_i = H // th
    wp = W + 2
    while (th * wp) % 8:          # keep the block's sublane dim 8-aligned
        wp += 1
    twp = th * wp
    assert twp >= 2 * wp + 2, "row tile too small for the 3x3 halo window"

    rows_total = (n_i + 1) * th   # 1 top pad + H data + bottom pads (+halo slack)
    xp = jnp.pad(x_nhwc.astype(jnp.bfloat16),
                 ((0, 0), (1, rows_total - H - 1), (1, wp - W - 1), (0, 0)))
    x_flat = xp.reshape(B, rows_total * wp, Cin)

    # (Cout, Cin_r, 3, 3) -> (9, Cin, cpad), zero padded, bf16 (MXU inputs).
    w9 = jnp.transpose(w_oihw, (2, 3, 1, 0)).reshape(9, Cin_r, Cout)
    w9 = jnp.pad(w9, ((0, 0), (0, Cin - Cin_r), (0, cpad - Cout))).astype(jnp.bfloat16)
    s_vec = jnp.pad(bn_scale.astype(jnp.float32), (0, cpad - Cout)).reshape(1, cpad)
    b_vec = jnp.pad(bn_bias.astype(jnp.float32), (0, cpad - Cout)).reshape(1, cpad)

    fuse_pos = (pos_nhwc is not None) and (stride == 1)
    in_specs = [
        pl.BlockSpec((1, twp, Cin), lambda b, i: (b, i, 0)),       # row block i
        pl.BlockSpec((1, twp, Cin), lambda b, i: (b, i + 1, 0)),   # halo: next row block
        pl.BlockSpec((9, Cin, cpad), lambda b, i: (0, 0, 0)),      # weights (resident)
        pl.BlockSpec((1, cpad), lambda b, i: (0, 0)),              # BN scale
        pl.BlockSpec((1, cpad), lambda b, i: (0, 0)),              # BN bias
    ]
    args = [x_flat, x_flat, w9, s_vec, b_vec]
    if fuse_pos:
        assert pos_nhwc.shape[1] == H and pos_nhwc.shape[2] == W, \
            "positional encoding shape must match the conv output"
        pos_p = jnp.pad(pos_nhwc.astype(jnp.float32),
                        ((0, 0), (0, 0), (0, wp - W), (0, cpad - pos_nhwc.shape[3])))
        pos_flat = pos_p.reshape(1, H * wp, cpad)
        in_specs.append(pl.BlockSpec((1, twp, cpad), lambda b, i: (0, i, 0)))
        args.append(pos_flat)

    flops = 2 * B * n_i * 9 * twp * Cin * cpad
    bytes_acc = (2 * x_flat.size * 2 + w9.size * 2 + B * H * wp * cpad * 4
                 + (args[-1].size * 4 if fuse_pos else 0))

    out_flat = pl.pallas_call(
        _make_conv_kernel(twp, wp, cpad, fuse_pos),
        out_shape=jax.ShapeDtypeStruct((B, H * wp, cpad), jnp.float32),
        grid=(B, n_i),
        in_specs=in_specs,
        out_specs=pl.BlockSpec((1, twp, cpad), lambda b, i: (b, i, 0)),
        scratch_shapes=[pltpu.VMEM((2 * twp, Cin), jnp.bfloat16)],
        compiler_params=pltpu.CompilerParams(
            dimension_semantics=("parallel", "parallel"),
            vmem_limit_bytes=_VMEM_LIMIT),
        cost_estimate=pl.CostEstimate(flops=int(flops), transcendentals=0,
                                      bytes_accessed=int(bytes_acc)),
    )(*args)

    y = out_flat.reshape(B, H, wp, cpad)[:, :, :W, :]
    if stride > 1:
        # TODO(synk): stride>1 is computed at stride 1 and subsampled (exact but
        # stride^2 extra work); a dedicated strided tap schedule would remove it.
        y = y[:, ::stride, ::stride, :]
        if pos_nhwc is not None:
            assert pos_nhwc.shape[1:3] == y.shape[1:3]
            y = y + jnp.pad(pos_nhwc.astype(jnp.float32),
                            ((0, 0), (0, 0), (0, 0),
                             (0, cpad - pos_nhwc.shape[3])))
    return y


def attention_pallas(x_bnc, wq_p, bq_p, wkv_p, bkv_p, gamma_11):
    """Position attention on (B, N, Cpad), query-row tiled."""
    B, N, cpad = x_bnc.shape
    tq = _pick_q_tile(N)
    n_q = N // tq

    flops = (2 * B * N * cpad * cpad
             + 2 * B * n_q * N * cpad * 2 * cpad
             + 4 * B * N * N * cpad)
    bytes_acc = B * N * cpad * 4 * (2 + n_q) + (wq_p.size + wkv_p.size) * 2

    return pl.pallas_call(
        _make_attention_kernel(cpad),
        out_shape=jax.ShapeDtypeStruct((B, N, cpad), jnp.float32),
        grid=(B, n_q),
        in_specs=[
            pl.BlockSpec((1, tq, cpad), lambda b, q: (b, q, 0)),     # query rows
            pl.BlockSpec((1, N, cpad), lambda b, q: (b, 0, 0)),      # all rows (K/V side)
            pl.BlockSpec((cpad, cpad), lambda b, q: (0, 0)),         # Wq (padded, resident)
            pl.BlockSpec((1, cpad), lambda b, q: (0, 0)),            # bq
            pl.BlockSpec((cpad, 2 * cpad), lambda b, q: (0, 0)),     # fused [Wk | Wv]
            pl.BlockSpec((1, 2 * cpad), lambda b, q: (0, 0)),        # fused [bk | bv]
            pl.BlockSpec(memory_space=pltpu.MemorySpace.SMEM),       # gamma scalar
        ],
        out_specs=pl.BlockSpec((1, tq, cpad), lambda b, q: (b, q, 0)),
        compiler_params=pltpu.CompilerParams(
            dimension_semantics=("parallel", "parallel"),
            vmem_limit_bytes=_VMEM_LIMIT),
        cost_estimate=pl.CostEstimate(flops=int(flops),
                                      transcendentals=int(B * N * N),
                                      bytes_accessed=int(bytes_acc)),
    )(x_bnc, x_bnc, wq_p, bq_p, wkv_p, bkv_p, gamma_11)


# ------------------------------------------------------------------ #
# Sine position encoding (parameter-free; built once in plain JAX)
# ------------------------------------------------------------------ #
def build_position_encoding(hidden_dim, shape):
    """PositionEmbeddingSine(hidden_dim // 2) on an all-False mask, NHWC."""
    num_pos_feats = hidden_dim // 2
    temperature = 10000.0
    B, H, W = shape
    not_mask = jnp.ones(shape, dtype=jnp.float32)
    y_embed = jnp.cumsum(not_mask, axis=1)
    x_embed = jnp.cumsum(not_mask, axis=2)
    dim_t = jnp.arange(num_pos_feats, dtype=jnp.float32)
    dim_t = temperature ** (2.0 * jnp.floor(dim_t / 2.0) / num_pos_feats)
    pos_x = x_embed[:, :, :, None] / dim_t
    pos_y = y_embed[:, :, :, None] / dim_t
    pos_x = jnp.stack((jnp.sin(pos_x[:, :, :, 0::2]),
                       jnp.cos(pos_x[:, :, :, 1::2])), axis=4).reshape(B, H, W, -1)
    pos_y = jnp.stack((jnp.sin(pos_y[:, :, :, 0::2]),
                       jnp.cos(pos_y[:, :, :, 1::2])), axis=4).reshape(B, H, W, -1)
    return jnp.concatenate((pos_y, pos_x), axis=3)               # (1, H, W, hidden_dim)


# ------------------------------------------------------------------ #
# Module
# ------------------------------------------------------------------ #
class TransConvEncoderPallas:
    """Pallas implementation of TransConvEncoderModule (the trans_head)."""

    def __init__(self, in_dim, attn_in_dims, attn_out_dims, strides, ratios,
                 downscale=True, pos_shape=None, key=None, gamma_init=0.0):
        del in_dim, downscale  # the strides list is what is actually used
        self.pos_shape = pos_shape
        self.attn_out_dims = list(attn_out_dims)
        self.layers = []
        self.pos_embeds = []
        key = jax.random.PRNGKey(0) if key is None else key
        for dim1, dim2, stride, ratio in zip(attn_in_dims, attn_out_dims,
                                             strides, ratios):
            key, *ks = jax.random.split(key, 16)
            cq = dim2 // ratio
            f32 = jnp.float32
            p = dict(
                stride=stride, dim2=dim2, cq=cq,
                # pre_conv: Conv3x3 (no bias) + BN(folded to scale/bias) + ReLU
                pre_w=0.05 * jax.random.normal(ks[0], (dim2, dim1, 3, 3), f32),
                pre_scale=1.0 + 0.1 * jax.random.normal(ks[1], (dim2,), f32),
                pre_bias=0.05 * jax.random.normal(ks[2], (dim2,), f32),
                # 1x1 q/k/v convs stored in matmul layout (Cin, Cout)
                wq=0.05 * jax.random.normal(ks[3], (dim2, cq), f32),
                bq=0.05 * jax.random.normal(ks[4], (cq,), f32),
                wk=0.05 * jax.random.normal(ks[5], (dim2, cq), f32),
                bk=0.05 * jax.random.normal(ks[6], (cq,), f32),
                wv=0.05 * jax.random.normal(ks[7], (dim2, dim2), f32),
                bv=0.05 * jax.random.normal(ks[8], (dim2,), f32),
                # PyTorch inits gamma to 0; a non-zero gamma_init (demo) makes
                # the attention branch actually contribute.
                gamma=jnp.float32(gamma_init),
                # final_conv: Conv3x3 (no bias) + BN(folded) + ReLU
                fin_w=0.05 * jax.random.normal(ks[9], (dim2, dim2, 3, 3), f32),
                fin_scale=1.0 + 0.1 * jax.random.normal(ks[10], (dim2,), f32),
                fin_bias=0.05 * jax.random.normal(ks[11], (dim2,), f32),
            )
            self.layers.append(p)
            if pos_shape is not None:
                self.pos_embeds.append(build_position_encoding(dim2, pos_shape))
            else:
                self.pos_embeds.append(None)

    @staticmethod
    def _padded_attn_params(p):
        dim2, cq = p["dim2"], p["cq"]
        cpad = _round_up(dim2, LANE)
        wq_p = jnp.pad(p["wq"], ((0, cpad - dim2), (0, cpad - cq))).astype(jnp.bfloat16)
        bq_p = jnp.pad(p["bq"], (0, cpad - cq)).reshape(1, cpad).astype(jnp.float32)
        wk_p = jnp.pad(p["wk"], ((0, cpad - dim2), (0, cpad - cq)))
        wv_p = jnp.pad(p["wv"], ((0, cpad - dim2), (0, cpad - dim2)))
        wkv_p = jnp.concatenate([wk_p, wv_p], axis=1).astype(jnp.bfloat16)
        bk_p = jnp.pad(p["bk"], (0, cpad - cq))
        bv_p = jnp.pad(p["bv"], (0, cpad - dim2))
        bkv_p = jnp.concatenate([bk_p, bv_p]).reshape(1, 2 * cpad).astype(jnp.float32)
        gamma_11 = p["gamma"].reshape(1, 1).astype(jnp.float32)
        return wq_p, bq_p, wkv_p, bkv_p, gamma_11

    def __call__(self, src_nchw):
        x = jnp.transpose(src_nchw, (0, 2, 3, 1)).astype(jnp.float32)   # NHWC
        for p, pos in zip(self.layers, self.pos_embeds):
            # pre_conv (+ BN + ReLU), with `x += pos` fused into its epilogue
            x = conv3x3_bn_relu(x, p["pre_w"], p["pre_scale"], p["pre_bias"],
                                pos_nhwc=pos, stride=p["stride"])
            B, H, W, cpad = x.shape
            wq_p, bq_p, wkv_p, bkv_p, gamma_11 = self._padded_attn_params(p)
            x_bnc = attention_pallas(x.reshape(B, H * W, cpad),
                                     wq_p, bq_p, wkv_p, bkv_p, gamma_11)
            x = x_bnc.reshape(B, H, W, cpad)
            x = conv3x3_bn_relu(x, p["fin_w"], p["fin_scale"], p["fin_bias"],
                                pos_nhwc=None, stride=1)
        c_last = self.attn_out_dims[-1]
        return jnp.transpose(x[..., :c_last], (0, 3, 1, 2))             # NCHW


# ------------------------------------------------------------------ #
# Pure-JAX f32 reference (for validation only)
# ------------------------------------------------------------------ #
def _reference_forward(model, src_nchw):
    hp = lax.Precision.HIGHEST

    def conv(x, w_oihw, scale, bias, stride):
        w = jnp.transpose(w_oihw, (2, 3, 1, 0))
        y = lax.conv_general_dilated(x, w, (stride, stride), ((1, 1), (1, 1)),
                                     dimension_numbers=("NHWC", "HWIO", "NHWC"),
                                     precision=hp)
        return jnp.maximum(y * scale + bias, 0.0)

    x = jnp.transpose(src_nchw, (0, 2, 3, 1)).astype(jnp.float32)
    for p, pos in zip(model.layers, model.pos_embeds):
        x = conv(x, p["pre_w"], p["pre_scale"], p["pre_bias"], p["stride"])
        if pos is not None:
            x = x + pos
        B, H, W, C = x.shape
        xf = x.reshape(B, H * W, C)
        q = jnp.einsum("bnc,cd->bnd", xf, p["wq"], precision=hp) + p["bq"]
        k = jnp.einsum("bnc,cd->bnd", xf, p["wk"], precision=hp) + p["bk"]
        v = jnp.einsum("bnc,cd->bnd", xf, p["wv"], precision=hp) + p["bv"]
        e = jnp.einsum("bic,bjc->bij", q, k, precision=hp)
        a = jax.nn.softmax(e, axis=-1)
        out = jnp.einsum("bij,bjc->bic", a, v, precision=hp)
        xf = p["gamma"] * out + xf
        x = xf.reshape(B, H, W, C)
        x = conv(x, p["fin_w"], p["fin_scale"], p["fin_bias"], 1)
    return jnp.transpose(x, (0, 3, 1, 2))


# ------------------------------------------------------------------ #
# Demo
# ------------------------------------------------------------------ #
if __name__ == "__main__":
    key = jax.random.PRNGKey(0)
    kx, kp = jax.random.split(key)

    B, Cin, H, W = 2, 4, 16, 16
    x = jax.random.normal(kx, (B, Cin, H, W), jnp.float32)

    model = TransConvEncoderPallas(
        in_dim=Cin,
        attn_in_dims=[Cin, 32],
        attn_out_dims=[32, 32],
        strides=[1, 1],
        ratios=[4, 4],
        downscale=False,
        pos_shape=(1, H, W),
        key=kp,
        gamma_init=0.5,   # torch default is 0.0; non-zero exercises attention
    )

    out = model(x)
    jax.block_until_ready(out)
    assert out.shape == (B, 32, H, W), out.shape
    assert bool(jnp.all(jnp.isfinite(out)))

    ref = _reference_forward(model, x)
    max_err = float(jnp.max(jnp.abs(out - ref)))
    assert max_err < 0.25, f"mismatch vs pure-JAX reference: max_err={max_err}"

    print("KERNEL_OK")
</pallas_src>

<mosaic_0001>
module attributes {stable_mosaic.version = 11 : i64} {
  func.func @kernel(%arg0: i32, %arg1: i32, %arg2: memref<1x144x4xbf16, #tpu.memory_space<vmem>>, %arg3: memref<1x144x4xbf16, #tpu.memory_space<vmem>>, %arg4: memref<9x4x128xbf16, #tpu.memory_space<vmem>>, %arg5: memref<1x128xf32, #tpu.memory_space<vmem>>, %arg6: memref<1x128xf32, #tpu.memory_space<vmem>>, %arg7: memref<1x144x128xf32, #tpu.memory_space<vmem>>, %arg8: memref<1x144x128xf32, #tpu.memory_space<vmem>>, %arg9: memref<288x4xbf16, #tpu.memory_space<vmem>>) attributes {dimension_semantics = [#tpu.dimension_semantics<parallel>, #tpu.dimension_semantics<parallel>], iteration_bounds = array<i64: 2, 2>, scalar_prefetch = 0 : i64, scratch_operands = 1 : i64, tpu.core_type = #tpu.core_type<tc>, window_params = [{transform_indices = @transform_0, window_bounds = array<i64: 1, 144, 4>}, {transform_indices = @transform_1, window_bounds = array<i64: 1, 144, 4>}, {pipeline_mode = #tpu.pipeline_mode<synchronous>, transform_indices = @transform_2, window_bounds = array<i64: 9, 4, 128>}, {pipeline_mode = #tpu.pipeline_mode<synchronous>, transform_indices = @transform_3, window_bounds = array<i64: 1, 128>}, {pipeline_mode = #tpu.pipeline_mode<synchronous>, transform_indices = @transform_4, window_bounds = array<i64: 1, 128>}, {transform_indices = @transform_5, window_bounds = array<i64: 1, 144, 128>}, {transform_indices = @transform_6, window_bounds = array<i64: 1, 144, 128>}]} {
    %c0 = arith.constant 0 : index
    %c0_0 = arith.constant 0 : index
    %c0_1 = arith.constant 0 : index
    %0 = vector.load %arg2[%c0, %c0_0, %c0_1] : memref<1x144x4xbf16, #tpu.memory_space<vmem>>, vector<1x144x4xbf16>
    %1 = vector.shape_cast %0 : vector<1x144x4xbf16> to vector<144x4xbf16>
    %c0_2 = arith.constant 0 : index
    %c0_3 = arith.constant 0 : index
    %2 = vector.load %arg9[%c0_2, %c0_3] : memref<288x4xbf16, #tpu.memory_space<vmem>>, vector<144x4xbf16>
    tpu.vector_store %arg9[%c0_2, %c0_3], %1 {strides = array<i32>} : memref<288x4xbf16, #tpu.memory_space<vmem>>, vector<144x4xbf16>,
    %c0_4 = arith.constant 0 : index
    %c0_5 = arith.constant 0 : index
    %c0_6 = arith.constant 0 : index
    %3 = vector.load %arg3[%c0_4, %c0_5, %c0_6] : memref<1x144x4xbf16, #tpu.memory_space<vmem>>, vector<1x144x4xbf16>
    %4 = vector.shape_cast %3 : vector<1x144x4xbf16> to vector<144x4xbf16>
    %c144 = arith.constant 144 : index
    %c0_7 = arith.constant 0 : index
    %5 = vector.load %arg9[%c144, %c0_7] : memref<288x4xbf16, #tpu.memory_space<vmem>>, vector<144x4xbf16>
    tpu.vector_store %arg9[%c144, %c0_7], %4 {strides = array<i32>} : memref<288x4xbf16, #tpu.memory_space<vmem>>, vector<144x4xbf16>,
    %cst = arith.constant 0.000000e+00 : f32
    %6 = vector.broadcast %cst : f32 to vector<144x128xf32>
    %c0_8 = arith.constant 0 : index
    %c0_9 = arith.constant 0 : index
    %7 = vector.load %arg9[%c0_8, %c0_9] : memref<288x4xbf16, #tpu.memory_space<vmem>>, vector<144x4xbf16>
    %c0_10 = arith.constant 0 : index
    %c0_11 = arith.constant 0 : index
    %c0_12 = arith.constant 0 : index
    %8 = vector.load %arg4[%c0_10, %c0_11, %c0_12] : memref<9x4x128xbf16, #tpu.memory_space<vmem>>, vector<1x4x128xbf16>
    %9 = vector.shape_cast %8 : vector<1x4x128xbf16> to vector<4x128xbf16>
    %cst_13 = arith.constant dense<0.000000e+00> : vector<144x128xf32>
    %10 = tpu.matmul %7, %9, %cst_13 {dimension_numbers = #tpu.dot_dimension_numbers<[1], [0], [0], [1], [0, 0, 1, 1], [], []>} : vector<144x4xbf16>, vector<4x128xbf16>, vector<144x128xf32> -> vector<144x128xf32>
    %11 = arith.addf %6, %10 : vector<144x128xf32>
    %c1 = arith.constant 1 : index
    %c0_14 = arith.constant 0 : index
    %12 = vector.load %arg9[%c1, %c0_14] : memref<288x4xbf16, #tpu.memory_space<vmem>>, vector<144x4xbf16>
    %c1_15 = arith.constant 1 : index
    %c0_16 = arith.constant 0 : index
    %c0_17 = arith.constant 0 : index
    %13 = vector.load %arg4[%c1_15, %c0_16, %c0_17] : memref<9x4x128xbf16, #tpu.memory_space<vmem>>, vector<1x4x128xbf16>
    %14 = vector.shape_cast %13 : vector<1x4x128xbf16> to vector<4x128xbf16>
    %cst_18 = arith.constant dense<0.000000e+00> : vector<144x128xf32>
    %15 = tpu.matmul %12, %14, %cst_18 {dimension_numbers = #tpu.dot_dimension_numbers<[1], [0], [0], [1], [0, 0, 1, 1], [], []>} : vector<144x4xbf16>, vector<4x128xbf16>, vector<144x128xf32> -> vector<144x128xf32>
    %16 = arith.addf %11, %15 : vector<144x128xf32>
    %c2 = arith.constant 2 : index
    %c0_19 = arith.constant 0 : index
    %17 = vector.load %arg9[%c2, %c0_19] : memref<288x4xbf16, #tpu.memory_space<vmem>>, vector<144x4xbf16>
    %c2_20 = arith.constant 2 : index
    %c0_21 = arith.constant 0 : index
    %c0_22 = arith.constant 0 : index
    %18 = vector.load %arg4[%c2_20, %c0_21, %c0_22] : memref<9x4x128xbf16, #tpu.memory_space<vmem>>, vector<1x4x128xbf16>
    %19 = vector.shape_cast %18 : vector<1x4x128xbf16> to vector<4x128xbf16>
    %cst_23 = arith.constant dense<0.000000e+00> : vector<144x128xf32>
    %20 = tpu.matmul %17, %19, %cst_23 {dimension_numbers = #tpu.dot_dimension_numbers<[1], [0], [0], [1], [0, 0, 1, 1], [], []>} : vector<144x4xbf16>, vector<4x128xbf16>, vector<144x128xf32> -> vector<144x128xf32>
    %21 = arith.addf %16, %20 : vector<144x128xf32>
    %c18 = arith.constant 18 : index
    %c0_24 = arith.constant 0 : index
    %22 = vector.load %arg9[%c18, %c0_24] : memref<288x4xbf16, #tpu.memory_space<vmem>>, vector<144x4xbf16>
    %c3 = arith.constant 3 : index
    %c0_25 = arith.constant 0 : index
    %c0_26 = arith.constant 0 : index
    %23 = vector.load %arg4[%c3, %c0_25, %c0_26] : memref<9x4x128xbf16, #tpu.memory_space<vmem>>, vector<1x4x128xbf16>
    %24 = vector.shape_cast %23 : vector<1x4x128xbf16> to vector<4x128xbf16>
    %cst_27 = arith.constant dense<0.000000e+00> : vector<144x128xf32>
    %25 = tpu.matmul %22, %24, %cst_27 {dimension_numbers = #tpu.dot_dimension_numbers<[1], [0], [0], [1], [0, 0, 1, 1], [], []>} : vector<144x4xbf16>, vector<4x128xbf16>, vector<144x128xf32> -> vector<144x128xf32>
    %26 = arith.addf %21, %25 : vector<144x128xf32>
    %c19 = arith.constant 19 : index
    %c0_28 = arith.constant 0 : index
    %27 = vector.load %arg9[%c19, %c0_28] : memref<288x4xbf16, #tpu.memory_space<vmem>>, vector<144x4xbf16>
    %c4 = arith.constant 4 : index
    %c0_29 = arith.constant 0 : index
    %c0_30 = arith.constant 0 : index
    %28 = vector.load %arg4[%c4, %c0_29, %c0_30] : memref<9x4x128xbf16, #tpu.memory_space<vmem>>, vector<1x4x128xbf16>
    %29 = vector.shape_cast %28 : vector<1x4x128xbf16> to vector<4x128xbf16>
    %cst_31 = arith.constant dense<0.000000e+00> : vector<144x128xf32>
    %30 = tpu.matmul %27, %29, %cst_31 {dimension_numbers = #tpu.dot_dimension_numbers<[1], [0], [0], [1], [0, 0, 1, 1], [], []>} : vector<144x4xbf16>, vector<4x128xbf16>, vector<144x128xf32> -> vector<144x128xf32>
    %31 = arith.addf %26, %30 : vector<144x128xf32>
    %c20 = arith.constant 20 : index
    %c0_32 = arith.constant 0 : index
    %32 = vector.load %arg9[%c20, %c0_32] : memref<288x4xbf16, #tpu.memory_space<vmem>>, vector<144x4xbf16>
    %c5 = arith.constant 5 : index
    %c0_33 = arith.constant 0 : index
    %c0_34 = arith.constant 0 : index
    %33 = vector.load %arg4[%c5, %c0_33, %c0_34] : memref<9x4x128xbf16, #tpu.memory_space<vmem>>, vector<1x4x128xbf16>
    %34 = vector.shape_cast %33 : vector<1x4x128xbf16> to vector<4x128xbf16>
    %cst_35 = arith.constant dense<0.000000e+00> : vector<144x128xf32>
    %35 = tpu.matmul %32, %34, %cst_35 {dimension_numbers = #tpu.dot_dimension_numbers<[1], [0], [0], [1], [0, 0, 1, 1], [], []>} : vector<144x4xbf16>, vector<4x128xbf16>, vector<144x128xf32> -> vector<144x128xf32>
    %36 = arith.addf %31, %35 : vector<144x128xf32>
    %c36 = arith.constant 36 : index
    %c0_36 = arith.constant 0 : index
    %37 = vector.load %arg9[%c36, %c0_36] : memref<288x4xbf16, #tpu.memory_space<vmem>>, vector<144x4xbf16>
    %c6 = arith.constant 6 : index
    %c0_37 = arith.constant 0 : index
    %c0_38 = arith.constant 0 : index
    %38 = vector.load %arg4[%c6, %c0_37, %c0_38] : memref<9x4x128xbf16, #tpu.memory_space<vmem>>, vector<1x4x128xbf16>
    %39 = vector.shape_cast %38 : vector<1x4x128xbf16> to vector<4x128xbf16>
    %cst_39 = arith.constant dense<0.000000e+00> : vector<144x128xf32>
    %40 = tpu.matmul %37, %39, %cst_39 {dimension_numbers = #tpu.dot_dimension_numbers<[1], [0], [0], [1], [0, 0, 1, 1], [], []>} : vector<144x4xbf16>, vector<4x128xbf16>, vector<144x128xf32> -> vector<144x128xf32>
    %41 = arith.addf %36, %40 : vector<144x128xf32>
    %c37 = arith.constant 37 : index
    %c0_40 = arith.constant 0 : index
    %42 = vector.load %arg9[%c37, %c0_40] : memref<288x4xbf16, #tpu.memory_space<vmem>>, vector<144x4xbf16>
    %c7 = arith.constant 7 : index
    %c0_41 = arith.constant 0 : index
    %c0_42 = arith.constant 0 : index
    %43 = vector.load %arg4[%c7, %c0_41, %c0_42] : memref<9x4x128xbf16, #tpu.memory_space<vmem>>, vector<1x4x128xbf16>
    %44 = vector.shape_cast %43 : vector<1x4x128xbf16> to vector<4x128xbf16>
    %cst_43 = arith.constant dense<0.000000e+00> : vector<144x128xf32>
    %45 = tpu.matmul %42, %44, %cst_43 {dimension_numbers = #tpu.dot_dimension_numbers<[1], [0], [0], [1], [0, 0, 1, 1], [], []>} : vector<144x4xbf16>, vector<4x128xbf16>, vector<144x128xf32> -> vector<144x128xf32>
    %46 = arith.addf %41, %45 : vector<144x128xf32>
    %c38 = arith.constant 38 : index
    %c0_44 = arith.constant 0 : index
    %47 = vector.load %arg9[%c38, %c0_44] : memref<288x4xbf16, #tpu.memory_space<vmem>>, vector<144x4xbf16>
    %c8 = arith.constant 8 : index
    %c0_45 = arith.constant 0 : index
    %c0_46 = arith.constant 0 : index
    %48 = vector.load %arg4[%c8, %c0_45, %c0_46] : memref<9x4x128xbf16, #tpu.memory_space<vmem>>, vector<1x4x128xbf16>
    %49 = vector.shape_cast %48 : vector<1x4x128xbf16> to vector<4x128xbf16>
    %cst_47 = arith.constant dense<0.000000e+00> : vector<144x128xf32>
    %50 = tpu.matmul %47, %49, %cst_47 {dimension_numbers = #tpu.dot_dimension_numbers<[1], [0], [0], [1], [0, 0, 1, 1], [], []>} : vector<144x4xbf16>, vector<4x128xbf16>, vector<144x128xf32> -> vector<144x128xf32>
    %51 = arith.addf %46, %50 : vector<144x128xf32>
    %c0_48 = arith.constant 0 : index
    %c0_49 = arith.constant 0 : index
    %52 = vector.load %arg5[%c0_48, %c0_49] : memref<1x128xf32, #tpu.memory_space<vmem>>, vector<1x128xf32>
    %53 = vector.broadcast %52 : vector<1x128xf32> to vector<144x128xf32>
    %54 = arith.mulf %51, %53 : vector<144x128xf32>
    %c0_50 = arith.constant 0 : index
    %c0_51 = arith.constant 0 : index
    %55 = vector.load %arg6[%c0_50, %c0_51] : memref<1x128xf32, #tpu.memory_space<vmem>>, vector<1x128xf32>
    %56 = vector.broadcast %55 : vector<1x128xf32> to vector<144x128xf32>
    %57 = arith.addf %54, %56 : vector<144x128xf32>
    %cst_52 = arith.constant 0.000000e+00 : f32
    %58 = vector.broadcast %cst_52 : f32 to vector<144x128xf32>
    %59 = arith.maximumf %57, %58 : vector<144x128xf32>
    %c0_53 = arith.constant 0 : index
    %c0_54 = arith.constant 0 : index
    %c0_55 = arith.constant 0 : index
    %60 = vector.load %arg7[%c0_53, %c0_54, %c0_55] : memref<1x144x128xf32, #tpu.memory_space<vmem>>, vector<1x144x128xf32>
    %61 = vector.shape_cast %60 : vector<1x144x128xf32> to vector<144x128xf32>
    %62 = arith.addf %59, %61 : vector<144x128xf32>
    %c0_56 = arith.constant 0 : index
    %c0_57 = arith.constant 0 : index
    %c0_58 = arith.constant 0 : index
    %63 = vector.load %arg8[%c0_56, %c0_57, %c0_58] : memref<1x144x128xf32, #tpu.memory_space<vmem>>, vector<1x144x128xf32>
    %64 = vector.shape_cast %63 : vector<1x144x128xf32> to vector<144x128xf32>
    %65 = vector.shape_cast %62 : vector<144x128xf32> to vector<1x144x128xf32>
    tpu.vector_store %arg8[%c0_56, %c0_57, %c0_58], %65 {strides = array<i32>} : memref<1x144x128xf32, #tpu.memory_space<vmem>>, vector<1x144x128xf32>,
    return
  }
  func.func @transform_0(%arg0: i32, %arg1: i32) -> (i32, i32, i32) {
    %c0_i32 = arith.constant 0 : i32
    %c0_i32_0 = arith.constant 0 : i32
    return %arg0, %arg1, %c0_i32 : i32, i32, i32
  }
  func.func @transform_1(%arg0: i32, %arg1: i32) -> (i32, i32, i32) {
    %c1_i32 = arith.constant 1 : i32
    %0 = arith.addi %arg1, %c1_i32 : i32
    %c0_i32 = arith.constant 0 : i32
    %c0_i32_0 = arith.constant 0 : i32
    return %arg0, %0, %c0_i32 : i32, i32, i32
  }
  func.func @transform_2(%arg0: i32, %arg1: i32) -> (i32, i32, i32) {
    %c0_i32 = arith.constant 0 : i32
    %c0_i32_0 = arith.constant 0 : i32
    %c0_i32_1 = arith.constant 0 : i32
    %c0_i32_2 = arith.constant 0 : i32
    return %c0_i32, %c0_i32_0, %c0_i32_1 : i32, i32, i32
  }
  func.func @transform_3(%arg0: i32, %arg1: i32) -> (i32, i32) {
    %c0_i32 = arith.constant 0 : i32
    %c0_i32_0 = arith.constant 0 : i32
    %c0_i32_1 = arith.constant 0 : i32
    return %c0_i32, %c0_i32_0 : i32, i32
  }
  func.func @transform_4(%arg0: i32, %arg1: i32) -> (i32, i32) {
    %c0_i32 = arith.constant 0 : i32
    %c0_i32_0 = arith.constant 0 : i32
    %c0_i32_1 = arith.constant 0 : i32
    return %c0_i32, %c0_i32_0 : i32, i32
  }
  func.func @transform_5(%arg0: i32, %arg1: i32) -> (i32, i32, i32) {
    %c0_i32 = arith.constant 0 : i32
    %c0_i32_0 = arith.constant 0 : i32
    %c0_i32_1 = arith.constant 0 : i32
    return %c0_i32, %arg1, %c0_i32_0 : i32, i32, i32
  }
  func.func @transform_6(%arg0: i32, %arg1: i32) -> (i32, i32, i32) {
    %c0_i32 = arith.constant 0 : i32
    %c0_i32_0 = arith.constant 0 : i32
    return %arg0, %arg1, %c0_i32 : i32, i32, i32
  }
}

</mosaic_0001>

<bundles_post_ra>
// kernel: tpu_custom_call.1
= control target key start
LH: loop header
LB: loop body
LE: loop exit
PB: predicated region body
PF: predicated region fallthrough
CT: control target
= control target key end

     0   :  { %11 = vsyncpa [#allocation4], 0  ;;  %s3325_s0 = inlined_call_operand.vmem [shape: bf16[2,432,4], index: 0, kind: input, shape index: {}]   ;;  %s3326_s1 = inlined_call_operand.vmem [shape: bf16[2,432,4], index: 1, kind: input, shape index: {}]   ;;  %s3327_s2 = inlined_call_operand.vmem [shape: bf16[9,4,128], index: 2, kind: input, shape index: {}]   ;;  %s3328_s3 = inlined_call_operand.vmem [shape: f32[1,128], index: 3, kind: input, shape index: {}]   ;;  %s3329_s4 = inlined_call_operand.vmem [shape: f32[1,128], index: 4, kind: input, shape index: {}]   ;;  %s3330_s5 = inlined_call_operand.vmem [shape: f32[1,288,128], index: 5, kind: input, shape index: {}]   ;;  %s3331_s6 = inlined_call_operand.hbm [shape: f32[2,288,128], index: 6, kind: output, shape index: {}]  }
   0x1   :  { %13 = vsyncpa [#allocation4 + $0x1], 0  ;;  %s2575_s21 = smov 0   ;;  %s2577_s22 = smov 0  }
   0x2   :  { %s2579_s23 = smov 0   ;;  %s2581_s24 = smov 0  }
   0x3   :  { %s2583_s25 = smov 0   ;;  %s2585_s26 = smov 0  }
   0x4   :  { %s2587_s27 = smov 0   ;;  %s2589_s28 = smov 0  }
   0x5 LB: > { %s2134_s29 = sadd.s32 4294967295, %s2536_s28   ;;  %s2135_s30 = sadd.s32 4294967294, %s2536_s28   ;;  %s2536_s28 = sphi %s2589_s28, %s19_s28   ;;  %s2532_s27 = sphi %s2587_s27, %s3343_s27   ;;  %s2528_s26 = sphi %s2585_s26, %s3342_s26   ;;  %s2524_s25 = sphi %s2583_s25, %s3341_s25   ;;  %s2520_s24 = sphi %s2581_s24, %s3340_s24   ;;  %s2516_s23 = sphi %s2579_s23, %s3339_s23   ;;  %s2512_s22 = sphi %s2577_s22, %s3338_s22   ;;  %s2508_s21 = sphi %s2575_s21, %s3337_s21  }
   0x6   : > { %s28_s7 = sadd.s32 1, %s2528_s26  ;;  %s31_s8 = sadd.s32 1, %s2532_s27 }
   0x7   : > { %p29_p0 = scmp.ge.s32.totalorder %s28_s7, 2  ;;  %p197_p1 = scmp.ne.s32.totalorder %s2516_s23, %s2512_s22 }
   0x8   : > { %p198_p2 = scmp.eq.s32.totalorder %s2134_s29, 3  ;;  %p203_p5 = scmp.ne.s32.totalorder %s2512_s22, %s2508_s21 }
   0x9   : > { %s3345_s7 = smov (%p29_p0, %s28_s7), 0  ;;  %s3347_s8 = smov (!%p29_p0, %s31_s8), %s2532_s27 }
   0xa   : > { %s183_s9 = ssub.s32 %s2528_s26, %s3345_s7  ;;  %p2626_p3 = por %p198_p2, %p197_p1 }
   0xb   : > { %p33_p4 = scmp.ge.s32.totalorder %s3347_s8, 2  ;;  %p204_p6 = scmp.eq.s32.totalorder %s2135_s30, 3 }
   0xc   : > { %p2138_p7 = scmp.ge.s32.totalorder %s2536_s28, 1  ;;  %p268_p9 = scmp.lt.s32.totalorder %s2536_s28, 5 }
   0xd   : > { %s3349_s8 = smov (%p33_p4, %s3347_s8), 0  ;;  %p2635_p8 = por %p204_p6, %p203_p5 }
   0xe   : > { %3334 = sst [smem:[#allocation6_spill]] %s3349_s8  ;;  %s182_s12 = ssub.s32 %s2532_s27, %s3349_s8 }
   0xf   : > { %s187_s13 = sadd.s32 1, %s2516_s23  ;;  %s184_s14 = sor.u32 %s183_s9, %s182_s12 }
  0x10   : > { %p269_p10 = pnand %p2138_p7, %p268_p9  ;;  %p185_p11 = scmp.eq.s32.totalorder %s184_s14, 0 }
  0x11   : > { %s2650_s18 = smul.u32 (!%p269_p10), 18, %s2520_s24  ;;  %p318_p12 = scmp.lt.s32.totalorder (!%p269_p10), %s2524_s25, 1 }
  0x12   : > { %s2644_s15 = scalar_select %p185_p11, %s2516_s23, %s187_s13  }
  0x13   : > { %272 = sbr.rel (%p269_p10) target bundleno = 530 (0x212), region = 44  ;;  %p320_p13 = scmp.lt.s32.totalorder (!%p269_p10), %s2650_s18, 53 }
  0x14   : > { %s327_s14 = sadd.s32 (!%p269_p10), 1, %s2520_s24  ;;  %p340_p1 = scmp.lt.s32.totalorder (!%p269_p10), %s2650_s18, 35 }
  0x15   : > { %s328_s30 = smul.u32 (!%p269_p10), 18, %s327_s14  ;;  %s314_s20 = sand.u32 (!%p269_p10), 1, %s2512_s22  }
  0x16   : > { %s2005_s9 = scalar_lea.sflag (!%p269_p10), [#allocation4], %s314_s20 }
  0x17   : > { %p331_p0 = scmp.lt.s32.totalorder (!%p269_p10), %s328_s30, 53 }
  0x18   : > { %v2142_v0 = vld [vmem:[%s3327_s2 + $0x2] sm:$0x3]  ;;  %vm595_vm0 = vcmask 1041408   ;;  %v2193_v2 = vld [vmem:[%s3327_s2 + $0x4] sm:$0x3]  ;;  %s2658_s29 = scalar_select %p318_p12, %s2524_s25, 1 }
  0x19   : > { %v597_v1 = vsel %vm595_vm0, %v2142_v0, 0  ;;  %v782_v3 = vsel %vm595_vm0, %v2193_v2, 0  ;;  %v438_v4 = vld [vmem:[%s3327_s2] sm:$0x3]  ;;  %s321_s13 = scalar_select %p320_p13, %s2650_s18, 53  ;;  %vm365_vm1 = vcmask 27648  }
  0x1a   : > { %2361 = vmatpush.bf16.msra.mxu1 %v597_v1  ;;  %2362 = vmatpush.bf16.msra.mxu2 %v597_v1  ;;  %v672_v5 = vsel %vm595_vm0, %v438_v4, 0  ;;  %s2365_s12 = smul.u32 54, %s2658_s29  ;;  %v2203_v16 = vld [vmem:[%s3327_s2 + $0x6] sm:$0x3]  ;;  %s3351_s30 = smov (!%p331_p0, %s328_s30), 53  ;;  %vm567_vm3 = vcmask 31744  }
  0x1b   : > { %2363 = vmatpush.bf16.msra.mxu3 %v597_v1  ;;  %606 = vmatpush.bf16.msra.mxu0 %v597_v1  ;;  %v972_v18 = vsel %vm595_vm0, %v2203_v16, 0  ;;  %vm490_vm2 = vsmask.f32 7424  ;;  %v2245_v57 = vld [vmem:[%s3327_s2 + $0x8] sm:$0x3]  ;;  %vm734_vm4 = vcmask 1046528  }
  0x1c   : > { %s323_s16 = sadd.s32 %s2365_s12, %s321_s13  ;;  %s334_s13 = sadd.s32 %s2365_s12, %s3351_s30  ;;  %v1170_v61 = vsel %vm595_vm0, %v2245_v57, 0  ;;  %vm1052_vm5 = vsmask.f32 6400  ;;  %vm1568_vm6 = vsmask.f32 5376  ;;  %vm1250_vm7 = vcmask 1045504  }
  0x1d   : > { %s2139_s17 = sshll.u32 %s323_s16, 2  ;;  %s2140_s29 = sshll.u32 %s334_s13, 2  ;;  %vm1766_vm8 = vcmask 1044480  }
  0x1e   : > { %791 = vmatpush.bf16.msrb.mxu2 %v782_v3  ;;  %681 = vmatpush.bf16.msrb.mxu1 %v672_v5  ;;  %s2674_s8 = scalar_lea.vmem %s3325_s0, %s2139_s17  ;;  %s2733_s16 = scalar_lea.vmem %s3326_s1, %s2140_s29 }
  0x1f   : > { %v349_v6 = vld [vmem:[%s2674_s8 + $0x8] sm:$0xf]  ;;  %v350_v7 = vld [vmem:[%s2674_s8 + $0xc] sm:$0xf]  ;;  %v351_v8 = vld [vmem:[%s2674_s8 + $0x10] sm:$0xf]  ;;  %981 = vmatpush.bf16.msrb.mxu3 %v972_v18  ;;  %1179 = vmatpush.bf16.msrb.mxu0 %v1170_v61 }
  0x20   : > { %v352_v9 = vld [vmem:[%s2674_s8 + $0x14] sm:$0xf]  ;;  %368 = vst.msk [vmem:[#allocation2 + $0x8] sm:$0xf] %vm365_vm1, %v349_v6  ;;  %v355_v10 = vld [vmem:[%s2674_s8 + $0x20] sm:$0xf] }
  0x21   : > { %369 = vst.msk [vmem:[#allocation2 + $0xc] sm:$0xf] %vm365_vm1, %v350_v7  ;;  %v356_v11 = vld [vmem:[%s2674_s8 + $0x24] sm:$0xf]  ;;  %v357_v12 = vld [vmem:[%s2674_s8 + $0x28] sm:$0xf] }
  0x22   : > { %370 = vst.msk [vmem:[#allocation2 + $0x10] sm:$0xf] %vm365_vm1, %v351_v8  ;;  %v358_v13 = vld [vmem:[%s2674_s8 + $0x2c] sm:$0xf]  ;;  %v361_v14 = vld [vmem:[%s2674_s8 + $0x38] sm:$0xf] }
  0x23   : > { %371 = vst.msk [vmem:[#allocation2 + $0x14] sm:$0xf] %vm365_vm1, %v352_v9  ;;  %v362_v15 = vld [vmem:[%s2674_s8 + $0x3c] sm:$0xf]  ;;  %v363_v17 = vld [vmem:[%s2674_s8 + $0x40] sm:$0xf] }
  0x24   : > { %374 = vst.msk [vmem:[#allocation2 + $0x20] sm:$0xf] %vm365_vm1, %v355_v10  ;;  %v364_v20 = vld [vmem:[%s2674_s8 + $0x44] sm:$0xf]  ;;  %v353_v21 = vld [vmem:[%s2674_s8 + $0x18] sm:$0xf] }
  0x25   : > { %375 = vst.msk [vmem:[#allocation2 + $0x24] sm:$0xf] %vm365_vm1, %v356_v11  ;;  %v354_v22 = vld [vmem:[%s2674_s8 + $0x1c] sm:$0xf]  ;;  %v359_v26 = vld [vmem:[%s2674_s8 + $0x30] sm:$0xf] }
  0x26   : > { %376 = vst.msk [vmem:[#allocation2 + $0x28] sm:$0xf] %vm365_vm1, %v357_v12  ;;  %v360_v27 = vld [vmem:[%s2674_s8 + $0x34] sm:$0xf]  ;;  %v384_v45 = vld [vmem:[%s2733_s16] sm:$0xf] }
  0x27   : > { %377 = vst.msk [vmem:[#allocation2 + $0x2c] sm:$0xf] %vm365_vm1, %v358_v13  ;;  %v347_v5 = vld [vmem:[%s2674_s8] sm:$0xf]  ;;  %v348_v7 = vld [vmem:[%s2674_s8 + $0x4] sm:$0xf] }
  0x28   : > { %v2699_v19 = vld [vmem:[#allocation2 + $0x8] sm:$0xff]  ;;  %380 = vst.msk [vmem:[#allocation2 + $0x38] sm:$0xf] %vm365_vm1, %v361_v14  ;;  %s341_s14 = scalar_select %p340_p1, %s2650_s18, 35 }
  0x29   : > { %381 = vst.msk [vmem:[#allocation2 + $0x3c] sm:$0xf] %vm365_vm1, %v362_v15  ;;  %v499_v24 = vshll.u32 %v2699_v19, 16  ;;  %v503_v25 = vshrl.u32 %v2699_v19, 16  ;;  %v2265_v11 = vld [vmem:[%s3327_s2 + $0xc] sm:$0x3] }
  0x2a   : > { %v2708_v23 = vld [vmem:[#allocation2 + $0x10] sm:$0xff]  ;;  %382 = vst.msk [vmem:[#allocation2 + $0x40] sm:$0xf] %vm365_vm1, %v363_v17  ;;  %v2307_v12 = vld [vmem:[%s3327_s2 + $0xe] sm:$0x3]  ;;  %v1488_v15 = vsel %vm595_vm0, %v2265_v11, 0 }
  0x2b   : > { %383 = vst.msk [vmem:[#allocation2 + $0x44] sm:$0xf] %vm365_vm1, %v364_v20  ;;  %v2716_v28 = vrot.slane %v499_v24, 1  ;;  %v507_v29 = vshll.u32 %v2708_v23, 16  ;;  %v511_v50 = vshrl.u32 %v2708_v23, 16  ;;  %v1686_v16 = vsel %vm595_vm0, %v2307_v12, 0 }
  0x2c   : > { %v2719_v30 = vld [vmem:[#allocation2 + $0x20] sm:$0xff]  ;;  %372 = vst.msk [vmem:[#allocation2 + $0x18] sm:$0xf] %vm365_vm1, %v353_v21  ;;  %v2255_v17 = vld [vmem:[%s3327_s2 + $0xa] sm:$0x3]  ;;  %v738_v11 = vrot.slane %v2708_v23, 1 }
  0x2d   : > { %373 = vst.msk [vmem:[#allocation2 + $0x1c] sm:$0xf] %vm365_vm1, %v354_v22  ;;  %v505_v31 = vor.u32 %v503_v25, %v2716_v28  ;;  %v509_v32 = vrot.slane %v507_v29, 1  ;;  %v523_v34 = vshll.u32 %v2719_v30, 16  ;;  %v527_v35 = vshrl.u32 %v2719_v30, 16  ;;  %v2836_v12 = vld [vmem:[#allocation2 + $0x20] sm:$0xff] }
  0x2e   : > { %v2724_v33 = vld [vmem:[#allocation2 + $0x28] sm:$0xff]  ;;  %378 = vst.msk [vmem:[#allocation2 + $0x30] sm:$0xf] %vm365_vm1, %v359_v26  ;;  %v1298_v21 = vsel %vm595_vm0, %v2255_v17, 0  ;;  %v1083_v17 = vshll.u32 %v2836_v12, 16  ;;  %s2141_s19 = sshll.u32 %s341_s14, 3 }
  0x2f   : > { %379 = vst.msk [vmem:[#allocation2 + $0x34] sm:$0xf] %vm365_vm1, %v360_v27  ;;  %v510_v36 = vsel %vm490_vm2, %v505_v31, %v509_v32  ;;  %v2736_v37 = vrot.slane %v523_v34, 1  ;;  %v531_v38 = vshll.u32 %v2724_v33, 16  ;;  %v513_v56 = vor.u32 %v511_v50, %v509_v32  ;;  %v856_v18 = vld [vmem:[#allocation2 + $0x8] sm:$0xe]  ;;  %s3184_s13 = scalar_lea.vmem %s3330_s5, %s2141_s19 }
  0x30   : > { %v2739_v39 = vld [vmem:[#allocation2 + $0x38] sm:$0xff]  ;;  %2176 = vmatmul.msk.bf16.vlgmr.msra.gmra.mxu1 %vm567_vm3, %v510_v36  ;;  %402 = vst.msk [vmem:[#allocation2 + $0x48] sm:$0xf] %vm365_vm1, %v384_v45  ;;  %v535_v59 = vshrl.u32 %v2724_v33, 16  ;;  %v2794_v20 = vld [vmem:[#allocation2 + $0xc] sm:$0xf]  ;;  %v896_v25 = vunpack.c.l.b16 %v856_v18 }
  0x31   : > { %v529_v40 = vor.u32 %v527_v35, %v2736_v37  ;;  %v533_v41 = vrot.slane %v531_v38, 1  ;;  %v547_v43 = vshll.u32 %v2739_v39, 16  ;;  %v551_v44 = vshrl.u32 %v2739_v39, 16  ;;  %366 = vst.msk [vmem:[#allocation2] sm:$0xf] %vm365_vm1, %v347_v5  ;;  %1307 = vmatpush.bf16.msra.mxu1 %v1298_v21  ;;  %v2802_v36 = vld [vmem:[#allocation2 + $0x10] sm:$0xff] }
  0x32   : > { %v2743_v42 = vld [vmem:[#allocation2 + $0x40] sm:$0xff]  ;;  %367 = vst.msk [vmem:[#allocation2 + $0x4] sm:$0xf] %vm365_vm1, %v348_v7  ;;  %v897_v26 = vunpack.c.l.b16 %v2794_v20  ;;  %s2364_s29 = smul.u32 144, %s314_s20 }
  0x33   : > { %v534_v46 = vsel %vm490_vm2, %v529_v40, %v533_v41  ;;  %v2749_v47 = vrot.slane %v547_v43, 1  ;;  %v555_v48 = vshll.u32 %v2743_v42, 16  ;;  %v537_v1 = vor.u32 %v535_v59, %v533_v41  ;;  %v2317_v40 = vld [vmem:[%s3327_s2 + $0x10] sm:$0x3]  ;;  %s2366_s14 = smul.u32 36, %s2524_s25 }
  0x34   : > { %v2752_v49 = vld [vmem:[#allocation2 + $0x18] sm:$0xff]  ;;  %2179 = vmatmul.msk.bf16.vlgmr.msra.gmra.mxu2 %vm567_vm3, %v534_v46  ;;  %v559_v3 = vshrl.u32 %v2743_v42, 16  ;;  %v915_v38 = vpack.c.b16 %v897_v26, %v896_v25  ;;  %v1814_v43 = vsel %vm595_vm0, %v2317_v40, 0  ;;  %v926_v46 = vrot.slane %v2802_v36, 1  ;;  %v2850_v25 = vld [vmem:[#allocation2 + $0x28] sm:$0xff]  ;;  %s3192_s12 = scalar_lea.vmem [#allocation3], %s2364_s29 }
  0x35   : > { %v553_v51 = vor.u32 %v551_v44, %v2749_v47  ;;  %v557_v52 = vrot.slane %v555_v48, 1  ;;  %v515_v53 = vshll.u32 %v2752_v49, 16  ;;  %v519_v14 = vshrl.u32 %v2752_v49, 16  ;;  %1497 = vmatpush.bf16.msra.mxu2 %v1488_v15 }
  0x36   : > { %v2759_v54 = vld [vmem:[#allocation2 + $0x30] sm:$0xff]  ;;  %v925_v45 = vrot.slane %v915_v38, 1  ;;  %v1054_v48 = vshrl.u32 %v915_v38, 16  ;;  %v1057_v50 = vshll.u32 %v915_v38, 16  ;;  %v930_v15 = vrot.slane %v2836_v12, 1 }
  0x37   : > { %v558_v55 = vsel %vm490_vm2, %v553_v51, %v557_v52  ;;  %v517_v58 = vrot.slane %v515_v53, 1  ;;  %v539_v60 = vshll.u32 %v2759_v54, 16  ;;  %v439_v62 = vld [vmem:[#allocation2 + $0x48] sm:$0x1]  ;;  %v561_v9 = vor.u32 %v559_v3, %v557_v52 }
  0x38   : > { %2182 = vmatmul.msk.bf16.vlgmr.msra.gmra.mxu3 %vm567_vm3, %v558_v55  ;;  %v479_v63 = vunpack.c.l.b16 %v439_v62  ;;  %v543_v24 = vshrl.u32 %v2759_v54, 16  ;;  %v1062_v51 = vshrl.u32 %v2802_v36, 16  ;;  %v1065_v52 = vshll.u32 %v2802_v36, 16  ;;  %v2359_v55 = vld [vmem:[#allocation2] sm:$0xe] }
  0x39   : > { %v518_v0 = vsel %vm490_vm2, %v513_v56, %v517_v58  ;;  %v541_v2 = vrot.slane %v539_v60, 1  ;;  %1695 = vmatpush.bf16.msra.mxu3 %v1686_v16  ;;  %v521_v22 = vor.u32 %v519_v14, %v517_v58  ;;  %v2355_v27 = vld [vmem:[#allocation2] sm:$0xff]   ;;  %v1059_v56 = vrot.slane %v1057_v50, 2 }
  0x3a   : > { %v2771_v4 = vpack.c.b16 %v479_v63, %v479_v63  ;;  %v492_v29 = vshrl.u32 %v2355_v27, 16  ;;  %v494_v31 = vshll.u32 %v2355_v27, 16  ;;  %v2358_v53 = vld [vmem:[#allocation2] sm:$0xf0]  ;;  %v1064_v57 = vrot.slane %v1062_v51, 1 }
  0x3b   : > { %v542_v8 = vsel %vm490_vm2, %v537_v1, %v541_v2  ;;  %v526_v32 = vsel %vm490_vm2, %v521_v22, %v2736_v37  ;;  %v545_v34 = vor.u32 %v543_v24, %v541_v2  ;;  %v1067_v58 = vrot.slane %v1065_v52, 2 }
  0x3c   : > { %v563_v6 = vshll.u32 %v2771_v4, 16  ;;  %v496_v35 = vrot.slane %v494_v31, 1  ;;  %v2360_v59 = vor.u32 %v2359_v55, %v2358_v53  ;;  %v736_v63 = vrot.slane %v2699_v19, 1  ;;  %v2878_v53 = vld [vmem:[#allocation2 + $0x38] sm:$0xff] }
  0x3d   : > { %v550_v44 = vsel %vm490_vm2, %v545_v34, %v2749_v47  ;;  %v927_v47 = vsel %vm734_vm4, %v925_v45, %v926_v46  ;;  %v1068_v61 = vor.u32 %v1067_v58, %v1064_v57  ;;  %v1080_v16 = vshrl.u32 %v2836_v12, 16  ;;  %v385_v57 = vld [vmem:[%s2733_s16 + $0x4] sm:$0xf] }
  0x3e   : > { %v565_v10 = vrot.slane %v563_v6, 1  ;;  %v497_v41 = vor.u32 %v496_v35, %v492_v29  ;;  %v735_v62 = vrot.slane %v2360_v59, 1  ;;  %v739_v14 = vsel %vm734_vm4, %v736_v63, %v738_v11  ;;  %403 = vst.msk [vmem:[#allocation2 + $0x4c] sm:$0xf] %vm365_vm1, %v385_v57 }
  0x3f   : > { %v1082_v21 = vrot.slane %v1080_v16, 1  ;;  %v1085_v22 = vrot.slane %v1083_v17, 2  ;;  %v932_v31 = vrot.slane %v2850_v25, 1  ;;  %v1092_v34 = vshll.u32 %v2850_v25, 16 }
  0x40   : > { %2177 = vmatmul.msk.bf16.gmra.mxu1 %vm567_vm3, %v518_v0  ;;  %v566_v13 = vsel %vm490_vm2, %v561_v9, %v565_v10  ;;  %v502_v37 = vsel %vm490_vm2, %v497_v41, %v2716_v28  ;;  %v1056_v28 = vrot.slane %v1054_v48, 1  ;;  %v2823_v0 = vld [vmem:[#allocation2 + $0x18] sm:$0xff]  ;;  %v737_v2 = vsel %vm734_vm4, %v735_v62, %v736_v63 }
  0x41   : > { %2175 = vmatmul.msk.bf16.vlgmr.msra.gmra.mxu0 %vm567_vm3, %v502_v37  ;;  %v928_v3 = vrot.slane %v2823_v0, 1  ;;  %v1071_v5 = vshrl.u32 %v2823_v0, 16  ;;  %v1074_v6 = vshll.u32 %v2823_v0, 16  ;;  %v1086_v24 = vor.u32 %v1085_v22, %v1082_v21 }
  0x42   : > { %1823 = vmatpush.bf16.msra.mxu0 %v1814_v43  ;;  %v1060_v60 = vor.u32 %v1059_v56, %v1056_v28  ;;  %v933_v35 = vsel %vm734_vm4, %v930_v15, %v932_v31  ;;  %v1094_v40 = vrot.slane %v1092_v34, 2  ;;  %v2864_v43 = vld [vmem:[#allocation2 + $0x30] sm:$0xff]  ;;  %v936_v56 = vrot.slane %v2878_v53, 1 }
  0x43   : > { %v929_v7 = vsel %vm734_vm4, %v926_v46, %v928_v3  ;;  %v1076_v9 = vrot.slane %v1074_v6, 2  ;;  %v931_v18 = vsel %vm734_vm4, %v928_v3, %v930_v15  ;;  %v934_v45 = vrot.slane %v2864_v43, 1  ;;  %v386_v3 = vld [vmem:[%s2733_s16 + $0x8] sm:$0xf] }
  0x44   : > { %2180 = vmatmul.msk.bf16.gmra.mxu2 %vm567_vm3, %v542_v8  ;;  %v1069_v1 = vsel %vm1052_vm5, %v1060_v60, %v1068_v61  ;;  %v1073_v8 = vrot.slane %v1071_v5, 1  ;;  %v1098_v46 = vshrl.u32 %v2864_v43, 16  ;;  %v1101_v48 = vshll.u32 %v2864_v43, 16  ;;  %404 = vst.msk [vmem:[#allocation2 + $0x50] sm:$0xf] %vm365_vm1, %v386_v3 }
  0x45   : > { %v935_v50 = vsel %vm734_vm4, %v932_v31, %v934_v45  ;;  %v1107_v58 = vshrl.u32 %v2878_v53, 16  ;;  %v1110_v59 = vshll.u32 %v2878_v53, 16  ;;  %v937_v60 = vsel %vm734_vm4, %v934_v45, %v936_v56  ;;  %v2920_v21 = vld [vmem:[#allocation2 + $0x48] sm:$0xff] }
  0x46   : > { %v1077_v10 = vor.u32 %v1076_v9, %v1073_v8  ;;  %v1100_v51 = vrot.slane %v1098_v46, 1  ;;  %v1103_v52 = vrot.slane %v1101_v48, 2  ;;  %v1125_v31 = vshrl.u32 %v2920_v21, 16 }
  0x48   : > { %2183 = vmatmul.msk.bf16.gmra.mxu3 %vm567_vm3, %v566_v13  ;;  %v1078_v13 = vsel %vm1052_vm5, %v1068_v61, %v1077_v10  ;;  %v1109_v61 = vrot.slane %v1107_v58, 1 }
  0x50   : > { %2178 = vmatmul.msk.bf16.gmra.mxu1 %vm567_vm3, %v526_v32  ;;  %v1089_v32 = vshrl.u32 %v2850_v25, 16 }
  0x51   : > { %2246 = vmatmul.msk.bf16.vlgmr.msrb.gmra.mxu0 %vm567_vm3, %v1069_v1  ;;  %v746_v1 = vrot.slane %v2759_v54, 1 }
  0x52   : > { %v1091_v38 = vrot.slane %v1089_v32, 1  ;;  %v1128_v32 = vshll.u32 %v2920_v21, 16 }
  0x54   : > { %2181 = vmatmul.msk.bf16.gmra.mxu2 %vm567_vm3, %v550_v44  ;;  %v1095_v41 = vor.u32 %v1094_v40, %v1091_v38  ;;  %v874_v38 = vld [vmem:[#allocation2 + $0x50] sm:$0x1]  ;;  %v1127_v40 = vrot.slane %v1125_v31, 1 }
  0x56   : > { %v1096_v44 = vsel %vm1052_vm5, %v1086_v24, %v1095_v41 }
  0x58   : > { %2236 = vmatmul.msk.bf16.vlgmr.msrb.gmra.mxu3 %vm567_vm3, %v927_v47  ;;  %v744_v47 = vrot.slane %v2724_v33, 1 }
  0x5a   : > { %v747_v6 = vsel %vm734_vm4, %v744_v47, %v746_v1 }
  0x60   : > { %2184 = vmatmul.msk.bf16.vlgmr.msrb.gmra.mxu1 %vm567_vm3, %v2355_v27  ;;  %v1087_v27 = vsel %vm1052_vm5, %v1077_v10, %v1086_v24 }
  0x61   : > { %2247 = vmatmul.msk.bf16.gmra.mxu0 %vm567_vm3, %v1078_v13 }
  0x64   : > { %2194 = vmatmul.msk.bf16.vlgmr.msrb.gmra.mxu2 %vm567_vm3, %v737_v2  ;;  %v2896_v2 = vld [vmem:[#allocation2 + $0x40] sm:$0xff] }
  0x65   : > { %v1116_v8 = vshrl.u32 %v2896_v2, 16  ;;  %v1119_v9 = vshll.u32 %v2896_v2, 16 }
  0x68   : > { %2237 = vmatmul.msk.bf16.gmra.mxu3 %vm567_vm3, %v929_v7  ;;  %v938_v7 = vrot.slane %v2896_v2, 1 }
  0x70   : > { %2185 = vmatmul.msk.bf16.gmra.mxu1 %vm567_vm3, %v2699_v19  ;;  %v740_v19 = vrot.slane %v2752_v49, 1 }
  0x71   : > { %2248 = vmatmul.msk.bf16.gmra.mxu0 %vm567_vm3, %v1087_v27  ;;  %v940_v27 = vrot.slane %v2920_v21, 1 }
  0x72   : > { %v741_v29 = vsel %vm734_vm4, %v738_v11, %v740_v19  ;;  %v939_v11 = vsel %vm734_vm4, %v936_v56, %v938_v7 }
  0x74   : > { %2195 = vmatmul.msk.bf16.gmra.mxu2 %vm567_vm3, %v739_v14  ;;  %v1118_v14 = vrot.slane %v1116_v8, 1 }
  0x78   : > { %2238 = vmatmul.msk.bf16.gmra.mxu3 %vm567_vm3, %v931_v18  ;;  %v748_v18 = vrot.slane %v2739_v39, 1 }
  0x80   : > { %2186 = vmatmul.msk.bf16.gmra.mxu1 %vm567_vm3, %v2708_v23  ;;  %v742_v23 = vrot.slane %v2719_v30, 1 }
  0x81   : > { %2249 = vmatmul.msk.bf16.gmra.mxu0 %vm567_vm3, %v1096_v44  ;;  %v914_v44 = vunpack.c.l.b16 %v874_v38 }
  0x82   : > { %v743_v37 = vsel %vm734_vm4, %v740_v19, %v742_v23  ;;  %v745_v28 = vsel %vm734_vm4, %v742_v23, %v744_v47  ;;  %v749_v19 = vsel %vm734_vm4, %v746_v1, %v748_v18  ;;  %v1046_v23 = vld [vmem:[#allocation2 + $0x50] sm:$0x3] }
  0x83   : > { %v1050_v46 = vunpack.c.l.b16 %v1046_v23 }
  0x84   : > { %2196 = vmatmul.msk.bf16.gmra.mxu2 %vm567_vm3, %v741_v29 }
  0x85   : > { %v2949_v56 = vpack.c.b16 %v1050_v46, %v1050_v46 }
  0x88   : > { %2239 = vmatmul.msk.bf16.gmra.mxu3 %vm567_vm3, %v933_v35  ;;  %v941_v35 = vsel %vm734_vm4, %v938_v7, %v940_v27 }
  0x90   : > { %2187 = vmatmul.msk.bf16.gmra.mxu1 %vm567_vm3, %v2752_v49  ;;  %v1104_v49 = vor.u32 %v1103_v52, %v1100_v51  ;;  %v924_v51 = vpack.c.b16 %v914_v44, %v914_v44  ;;  %v1372_v52 = vld [vmem:[#allocation2 + $0x10] sm:$0xc] }
  0x92   : > { %v1105_v55 = vsel %vm1052_vm5, %v1095_v41, %v1104_v49  ;;  %v1130_v41 = vrot.slane %v1128_v32, 2  ;;  %v942_v58 = vrot.slane %v924_v51, 1  ;;  %v1760_v51 = vld [vmem:[#allocation2 + $0x10] sm:$0x8] }
  0x93   : > { %2250 = vmatmul.msk.bf16.gmra.mxu0 %vm567_vm3, %v1105_v55 }
  0x94   : > { %2197 = vmatmul.msk.bf16.gmra.mxu2 %vm567_vm3, %v743_v37  ;;  %v1131_v45 = vor.u32 %v1130_v41, %v1127_v40  ;;  %v943_v3 = vsel %vm734_vm4, %v940_v27, %v942_v58  ;;  %v1244_v41 = vld [vmem:[#allocation2 + $0x8] sm:$0xc] }
  0x98   : > { %2240 = vmatmul.msk.bf16.gmra.mxu3 %vm567_vm3, %v935_v50  ;;  %v750_v50 = vrot.slane %v2743_v42, 1 }
  0x9a   : > { %v751_v57 = vsel %vm734_vm4, %v748_v18, %v750_v50 }
  0xa0   : > { %2188 = vmatmul.msk.bf16.gmra.mxu1 %vm567_vm3, %v2719_v30  ;;  %v1112_v30 = vrot.slane %v1110_v59, 2  ;;  %v1412_v59 = vunpack.c.l.b16 %v1372_v52 }
  0xa2   : > { %v1113_v62 = vor.u32 %v1112_v30, %v1109_v61  ;;  %v1134_v30 = vshrl.u32 %v2949_v56, 16 }
  0xa4   : > { %2198 = vmatmul.msk.bf16.gmra.mxu2 %vm567_vm3, %v745_v28  ;;  %v1114_v5 = vsel %vm1052_vm5, %v1104_v49, %v1113_v62  ;;  %v1373_v49 = vld [vmem:[#allocation2 + $0x14] sm:$0xf]  ;;  %v1136_v8 = vrot.slane %v1134_v30, 1 }
  0xa5   : > { %2251 = vmatmul.msk.bf16.gmra.mxu0 %vm567_vm3, %v1114_v5 }
  0xa8   : > { %2241 = vmatmul.msk.bf16.gmra.mxu3 %vm567_vm3, %v937_v60  ;;  %v1413_v60 = vunpack.c.l.b16 %v1373_v49 }
  0xaa   : > { %v2965_v5 = vpack.c.b16 %v1413_v60, %v1412_v59 }
  0xad   : > { %v2893_v63 = vpop.f32.mrf.mxu1 }
  0xb0   : > { %2189 = vmatmul.msk.bf16.gmra.mxu1 %vm567_vm3, %v2724_v33  ;;  %v1121_v33 = vrot.slane %v1119_v9, 2 }
  0xb2   : > { %v1122_v16 = vor.u32 %v1121_v33, %v1118_v14  ;;  %v1573_v14 = vshll.u32 %v2965_v5, 16 }
  0xb4   : > { %2199 = vmatmul.msk.bf16.gmra.mxu2 %vm567_vm3, %v747_v6  ;;  %v1123_v24 = vsel %vm1052_vm5, %v1113_v62, %v1122_v16  ;;  %v1132_v28 = vsel %vm1052_vm5, %v1122_v16, %v1131_v45  ;;  %v1137_v62 = vshll.u32 %v2949_v56, 16  ;;  %v1575_v32 = vrot.slane %v1573_v14, 3 }
  0xb5   : > { %v2909_v10 = vpop.f32.mrf.mxu1  ;;  %2252 = vmatmul.msk.bf16.gmra.mxu0 %vm567_vm3, %v1123_v24 }
  0xb6   : > { %v1139_v9 = vrot.slane %v1137_v62, 2 }
  0xb7   : > { %v2912_v13 = vpop.f32.mrf.mxu2 }
  0xb8   : > { %2242 = vmatmul.msk.bf16.gmra.mxu3 %vm567_vm3, %v939_v11  ;;  %v1570_v11 = vshrl.u32 %v2965_v5, 16  ;;  %v1140_v24 = vor.u32 %v1139_v9, %v1136_v8 }
  0xba   : > { %v1572_v31 = vrot.slane %v1570_v11, 2  ;;  %v1141_v46 = vsel %vm1052_vm5, %v1131_v45, %v1140_v24  ;;  %v1252_v11 = vrot.slane %v2802_v36, 2 }
  0xbb   : > { %v2915_v15 = vpop.f32.mrf.mxu3 }
  0xbc   : > { %v1576_v49 = vor.u32 %v1575_v32, %v1572_v31 }
  0xbd   : > { %v2917_v17 = vpop.f32.mrf.mxu1 }
  0xbe   : > { %v608_v55 = vpop.f32.mrf.mxu0 }
  0xbf   : > { %v2922_v22 = vpop.f32.mrf.mxu2 }
  0xc0   : > { %2190 = vmatmul.msk.bf16.gmra.mxu1 %vm567_vm3, %v2759_v54 }
  0xc3   : > { %v2930_v29 = vpop.f32.mrf.mxu3 }
  0xc4   : > { %2200 = vmatmul.msk.bf16.gmra.mxu2 %vm567_vm3, %v749_v19  ;;  %v752_v19 = vrot.slane %v2771_v4, 1 }
  0xc5   : > { %v2935_v34 = vpop.f32.mrf.mxu1  ;;  %2253 = vmatmul.msk.bf16.gmra.mxu0 %vm567_vm3, %v1132_v28  ;;  %v1248_v28 = vunpack.c.l.b16 %v1244_v41 }
  0xc6   : > { %v610_v7 = vpop.f32.mrf.mxu0  ;;  %v753_v52 = vsel %vm734_vm4, %v750_v50, %v752_v19 }
  0xc7   : > { %v2938_v54 = vpop.f32.mrf.mxu2  ;;  %v1249_v45 = vpack.c.b16 %v897_v26, %v1248_v28 }
  0xc8   : > { %2243 = vmatmul.msk.bf16.gmra.mxu3 %vm567_vm3, %v941_v35 }
  0xc9   : > { %v1251_v9 = vrot.slane %v1249_v45, 2 }
  0xcb   : > { %v2941_v37 = vpop.f32.mrf.mxu3 }
  0xcd   : > { %v2943_v48 = vpop.f32.mrf.mxu1 }
  0xce   : > { %v1181_v44 = vpop.f32.mrf.mxu0 }
  0xcf   : > { %v2946_v47 = vpop.f32.mrf.mxu2 }
  0xd0   : > { %2191 = vmatmul.msk.bf16.gmra.mxu1 %vm567_vm3, %v2739_v39  ;;  %v2963_v39 = vld [vmem:[#allocation2 + $0x18] sm:$0xff] }
  0xd1   : > { %v1578_v33 = vshrl.u32 %v2963_v39, 16  ;;  %v1581_v16 = vshll.u32 %v2963_v39, 16  ;;  %v1768_v24 = vrot.slane %v2963_v39, 3  ;;  %v1442_v36 = vrot.slane %v2963_v39, 2 }
  0xd3   : > { %v2955_v61 = vpop.f32.mrf.mxu3  ;;  %v1580_v35 = vrot.slane %v1578_v33, 2  ;;  %v1583_v38 = vrot.slane %v1581_v16, 3 }
  0xd4   : > { %2201 = vmatmul.msk.bf16.gmra.mxu2 %vm567_vm3, %v751_v57 }
  0xd5   : > { %v2960_v1 = vpop.f32.mrf.mxu1  ;;  %v1584_v4 = vor.u32 %v1583_v38, %v1580_v35  ;;  %2254 = vmatmul.msk.bf16.gmra.mxu0 %vm567_vm3, %v1141_v46 }
  0xd6   : > { %v1183_v62 = vpop.f32.mrf.mxu0 }
  0xd7   : > { %v2967_v6 = vpop.f32.mrf.mxu2  ;;  %v1585_v59 = vsel %vm1568_vm6, %v1576_v49, %v1584_v4  ;;  %v3007_v49 = vld [vmem:[#allocation2 + $0x28] sm:$0xff] }
  0xd8   : > { %2244 = vmatmul.msk.bf16.gmra.mxu3 %vm567_vm3, %v943_v3  ;;  %v1596_v45 = vshrl.u32 %v3007_v49, 16 }
  0xdb   : > { %v983_v18 = vpop.f32.mrf.mxu3 }
  0xdd   : > { %v683_v27 = vpop.f32.mrf.mxu1 }
  0xde   : > { %v684_v40 = vadd.f32 %v683_v27, %v608_v55  ;;  %v1764_v55 = vunpack.c.l.b16 %v1760_v51  ;;  %v1253_v27 = vsel %vm1250_vm7, %v1251_v9, %v1252_v11  ;;  %v1186_v38 = vpop.f32.mrf.mxu0 }
  0xdf   : > { %v2975_v23 = vpop.f32.mrf.mxu2 }
  0xe0   : > { %2192 = vmatmul.msk.bf16.gmra.mxu1 %vm567_vm3, %v2743_v42  ;;  %v2986_v42 = vld [vmem:[#allocation2 + $0x20] sm:$0xff]  ;;  %v1765_v3 = vpack.c.b16 %v1413_v60, %v1764_v55 }
  0xe1   : > { %v1587_v14 = vshrl.u32 %v2986_v42, 16  ;;  %v1590_v33 = vshll.u32 %v2986_v42, 16  ;;  %v1444_v9 = vrot.slane %v2986_v42, 2 }
  0xe2   : > { %v1767_v26 = vrot.slane %v1765_v3, 3  ;;  %v1770_v3 = vrot.slane %v2986_v42, 3 }
  0xe3   : > { %v985_v57 = vpop.f32.mrf.mxu3  ;;  %v1589_v31 = vrot.slane %v1587_v14, 2  ;;  %v1592_v32 = vrot.slane %v1590_v33, 3  ;;  %v1598_v14 = vrot.slane %v1596_v45, 2 }
  0xe4   : > { %2202 = vmatmul.msk.bf16.gmra.mxu2 %vm567_vm3, %v753_v52 }
  0xe5   : > { %v685_v58 = vpop.f32.mrf.mxu1 }
  0xe6   : > { %v686_v30 = vadd.f32 %v685_v58, %v610_v7  ;;  %v1441_v7 = vrot.slane %v2965_v5, 2  ;;  %v1188_v58 = vpop.f32.mrf.mxu0 }
  0xe7   : > { %v793_v50 = vpop.f32.mrf.mxu2 }
  0xe8   : > { %v838_v8 = vadd.f32 %v793_v50, %v684_v40  ;;  %2308 = vmatmul.msk.bf16.vlgmr.msra.gmra.mxu3 %vm567_vm3, %v1585_v59  ;;  %v1769_v40 = vsel %vm1766_vm8, %v1767_v26, %v1768_v24  ;;  %v1443_v5 = vsel %vm1250_vm7, %v1441_v7, %v1442_v36  ;;  %v1771_v7 = vsel %vm1766_vm8, %v1768_v24, %v1770_v3 }
  0xe9   : > { %2318 = vmatmul.msk.bf16.vlgmr.msra.gmra.mxu0 %vm567_vm3, %v1769_v40 }
  0xea   : > { %v1028_v16 = vadd.f32 %v983_v18, %v838_v8 }
  0xeb   : > { %v988_v20 = vpop.f32.mrf.mxu3 }
  0xec   : > { %v2994_v60 = vadd.f32 %v1181_v44, %v1028_v16  ;;  %v1593_v44 = vor.u32 %v1592_v32, %v1589_v31 }
  0xed   : > { %v688_v19 = vpop.f32.mrf.mxu1 }
  0xee   : > { %v689_v35 = vadd.f32 %v688_v19, %v2893_v63  ;;  %v1594_v63 = vsel %vm1568_vm6, %v1584_v4, %v1593_v44  ;;  %v1191_v26 = vpop.f32.mrf.mxu0 }
  0xef   : > { %v795_v18 = vpop.f32.mrf.mxu2 }
  0xf0   : > { %v839_v41 = vadd.f32 %v795_v18, %v686_v30  ;;  %2256 = vmatmul.msk.bf16.vlgmr.msra.gmra.mxu1 %vm567_vm3, %v1253_v27  ;;  %v1599_v30 = vshll.u32 %v3007_v49, 16 }
  0xf2   : > { %v1029_v46 = vadd.f32 %v985_v57, %v839_v41  ;;  %v1254_v57 = vrot.slane %v2823_v0, 2  ;;  %v1601_v33 = vrot.slane %v1599_v30, 3 }
  0xf3   : > { %v990_v51 = vpop.f32.mrf.mxu3 }
  0xf4   : > { %2298 = vmatmul.msk.bf16.vlgmr.msra.gmra.mxu2 %vm567_vm3, %v1443_v5  ;;  %v3004_v39 = vadd.f32 %v1183_v62, %v1029_v46  ;;  %v1602_v27 = vor.u32 %v1601_v33, %v1598_v14  ;;  %v3049_v33 = vld [vmem:[#allocation2 + $0x38] sm:$0xff] }
  0xf5   : > { %v690_v52 = vpop.f32.mrf.mxu1 }
  0xf6   : > { %v691_v28 = vadd.f32 %v690_v52, %v2909_v10  ;;  %v1255_v10 = vsel %vm1250_vm7, %v1252_v11, %v1254_v57  ;;  %v1772_v52 = vrot.slane %v3007_v49, 3 }
  0xf7   : > { %v798_v55 = vpop.f32.mrf.mxu2 }
  0xf8   : > { %v840_v59 = vadd.f32 %v798_v55, %v689_v35  ;;  %2309 = vmatmul.msk.bf16.gmra.mxu3 %vm567_vm3, %v1594_v63  ;;  %v3028_v35 = vld [vmem:[#allocation2 + $0x30] sm:$0xff]  ;;  %v1773_v30 = vsel %vm1766_vm8, %v1770_v3, %v1772_v52 }
  0xf9   : > { %2319 = vmatmul.msk.bf16.gmra.mxu0 %vm567_vm3, %v1771_v7  ;;  %v1605_v41 = vshrl.u32 %v3028_v35, 16  ;;  %v1608_v5 = vshll.u32 %v3028_v35, 16  ;;  %v1614_v7 = vshrl.u32 %v3049_v33, 16 }
  0xfa   : > { %v1030_v50 = vadd.f32 %v988_v20, %v840_v59  ;;  %v1445_v20 = vsel %vm1250_vm7, %v1442_v36, %v1444_v9  ;;  %v1256_v36 = vrot.slane %v2836_v12, 2 }
  0xfb   : > { %v993_v62 = vpop.f32.mrf.mxu3  ;;  %v1607_v55 = vrot.slane %v1605_v41, 2 }
  0xfc   : > { %v3015_v4 = vadd.f32 %v1186_v38, %v1030_v50  ;;  %v1193_v38 = vpop.f32.mrf.mxu0 }
  0xfd   : > { %v693_v8 = vpop.f32.mrf.mxu1 }
  0xfe   : > { %v694_v16 = vadd.f32 %v693_v8, %v2917_v17  ;;  %v1603_v17 = vsel %vm1568_vm6, %v1593_v44, %v1602_v27 }
  0xff   : > { %v800_v0 = vpop.f32.mrf.mxu2 }
 0x100   : > { %v841_v19 = vadd.f32 %v800_v0, %v691_v28  ;;  %2257 = vmatmul.msk.bf16.gmra.mxu1 %vm567_vm3, %v1255_v10  ;;  %v1446_v28 = vrot.slane %v3007_v49, 2 }
 0x102   : > { %v1031_v31 = vadd.f32 %v990_v51, %v841_v19  ;;  %v1617_v19 = vshll.u32 %v3049_v33, 16 }
 0x103   : > { %v995_v11 = vpop.f32.mrf.mxu3 }
 0x104   : > { %2299 = vmatmul.msk.bf16.gmra.mxu2 %vm567_vm3, %v1445_v20  ;;  %v3025_v42 = vadd.f32 %v1188_v58, %v1031_v31  ;;  %v1610_v58 = vrot.slane %v1608_v5, 3  ;;  %v1196_v45 = vpop.f32.mrf.mxu0 }
 0x105   : > { %v695_v32 = vpop.f32.mrf.mxu1 }
 0x106   : > { %v696_v24 = vadd.f32 %v695_v32, %v2935_v34  ;;  %v1257_v34 = vsel %vm1250_vm7, %v1254_v57, %v1256_v36  ;;  %v1611_v8 = vor.u32 %v1610_v58, %v1607_v55  ;;  %v3069_v55 = vld [vmem:[#allocation2 + $0x40] sm:$0xff] }
 0x107   : > { %v803_v18 = vpop.f32.mrf.mxu2 }
 0x108   : > { %v842_v40 = vadd.f32 %v803_v18, %v694_v16  ;;  %2310 = vmatmul.msk.bf16.gmra.mxu3 %vm567_vm3, %v1603_v17  ;;  %v1448_v17 = vrot.slane %v3028_v35, 2  ;;  %v1619_v18 = vrot.slane %v1617_v19, 3 }
 0x109   : > { %2320 = vmatmul.msk.bf16.gmra.mxu0 %vm567_vm3, %v1773_v30  ;;  %v1626_v30 = vshll.u32 %v3069_v55, 16 }
 0x10a   : > { %v1032_v46 = vadd.f32 %v993_v62, %v842_v40  ;;  %v1447_v62 = vsel %vm1250_vm7, %v1444_v9, %v1446_v28  ;;  %v1258_v9 = vrot.slane %v2850_v25, 2  ;;  %v1449_v5 = vsel %vm1250_vm7, %v1446_v28, %v1448_v17 }
 0x10b   : > { %v998_v51 = vpop.f32.mrf.mxu3 }
 0x10c   : > { %v3036_v44 = vadd.f32 %v1191_v26, %v1032_v46  ;;  %v1198_v0 = vpop.f32.mrf.mxu0 }
 0x10d   : > { %v698_v63 = vpop.f32.mrf.mxu1 }
 0x10e   : > { %v699_v59 = vadd.f32 %v698_v63, %v2943_v48  ;;  %v1612_v48 = vsel %vm1568_vm6, %v1602_v27, %v1611_v8 }
 0x10f   : > { %v805_v12 = vpop.f32.mrf.mxu2 }
 0x110   : > { %v843_v50 = vadd.f32 %v805_v12, %v696_v24  ;;  %2258 = vmatmul.msk.bf16.gmra.mxu1 %vm567_vm3, %v1257_v34  ;;  %v1616_v24 = vrot.slane %v1614_v7, 2  ;;  %v1260_v12 = vrot.slane %v2864_v43, 2 }
 0x112   : > { %v1033_v10 = vadd.f32 %v995_v11, %v843_v50  ;;  %v1774_v11 = vrot.slane %v3028_v35, 3  ;;  %v1620_v46 = vor.u32 %v1619_v18, %v1616_v24  ;;  %v3092_v24 = vld [vmem:[#allocation2 + $0x48] sm:$0xff] }
 0x113   : > { %v1000_v57 = vpop.f32.mrf.mxu3 }
 0x114   : > { %2300 = vmatmul.msk.bf16.gmra.mxu2 %vm567_vm3, %v1447_v62  ;;  %v3046_v49 = vadd.f32 %v1193_v38, %v1033_v10  ;;  %v1201_v40 = vpop.f32.mrf.mxu0  ;;  %v1775_v25 = vsel %vm1766_vm8, %v1772_v52, %v1774_v11  ;;  %v1621_v34 = vsel %vm1568_vm6, %v1611_v8, %v1620_v46  ;;  %v1776_v8 = vrot.slane %v3049_v33, 3 }
 0x115   : > { %v700_v14 = vpop.f32.mrf.mxu1 }
 0x116   : > { %v701_v3 = vadd.f32 %v700_v14, %v2960_v1  ;;  %v1259_v1 = vsel %vm1250_vm7, %v1256_v36, %v1258_v9  ;;  %v1450_v14 = vrot.slane %v3049_v33, 2  ;;  %v1777_v7 = vsel %vm1766_vm8, %v1774_v11, %v1776_v8 }
 0x117   : > { %v808_v16 = vpop.f32.mrf.mxu2 }
 0x118   : > { %v844_v26 = vadd.f32 %v808_v16, %v699_v59  ;;  %2311 = vmatmul.msk.bf16.gmra.mxu3 %vm567_vm3, %v1612_v48  ;;  %v387_v16 = vld [vmem:[%s2733_s16 + $0xc] sm:$0xf] }
 0x119   : > { %2321 = vmatmul.msk.bf16.gmra.mxu0 %vm567_vm3, %v1775_v25  ;;  %405 = vst.msk [vmem:[#allocation2 + $0x54] sm:$0xf] %vm365_vm1, %v387_v16  ;;  %v1632_v25 = vshrl.u32 %v3092_v24, 16 }
 0x11a   : > { %v1034_v20 = vadd.f32 %v998_v51, %v844_v26 }
 0x11b   : > { %v1003_v31 = vpop.f32.mrf.mxu3 }
 0x11c   : > { %v3057_v27 = vadd.f32 %v1196_v45, %v1034_v20  ;;  %v1203_v59 = vpop.f32.mrf.mxu0  ;;  %v1623_v45 = vshrl.u32 %v3069_v55, 16  ;;  %v1451_v20 = vsel %vm1250_vm7, %v1448_v17, %v1450_v14 }
 0x11d   : > { %v703_v32 = vpop.f32.mrf.mxu1 }
 0x11e   : > { %v704_v52 = vadd.f32 %v703_v32, %v2912_v13  ;;  %v1261_v13 = vsel %vm1250_vm7, %v1258_v9, %v1260_v12  ;;  %v1625_v48 = vrot.slane %v1623_v45, 2 }
 0x11f   : > { %v810_v38 = vpop.f32.mrf.mxu2 }
 0x120   : > { %v845_v41 = vadd.f32 %v810_v38, %v701_v3  ;;  %2259 = vmatmul.msk.bf16.gmra.mxu1 %vm567_vm3, %v1259_v1  ;;  %v1628_v3 = vrot.slane %v1626_v30, 3 }
 0x122   : > { %v1035_v51 = vadd.f32 %v1000_v57, %v845_v41  ;;  %v1635_v41 = vshll.u32 %v3092_v24, 16 }
 0x123   : > { %v1005_v63 = vpop.f32.mrf.mxu3 }
 0x124   : > { %2301 = vmatmul.msk.bf16.gmra.mxu2 %vm567_vm3, %v1449_v5  ;;  %v3066_v36 = vadd.f32 %v1198_v0, %v1035_v51  ;;  %v1206_v26 = vpop.f32.mrf.mxu0  ;;  %v388_v51 = vld [vmem:[%s2733_s16 + $0x10] sm:$0xf]  ;;  %s2016_s16 = sadd.s32 %s2366_s14, %s2650_s18  ;;  %s2019_s18 = sshll.u32 %s3192_s12, 4  ;;  %s2020_s18 = int_to_ptr.vmem [resolvable:$true] %s2019_s18 }
 0x125   : > { %v705_v35 = vpop.f32.mrf.mxu1  ;;  %406 = vst.msk [vmem:[#allocation2 + $0x58] sm:$0xf] %vm365_vm1, %v388_v51  ;;  %s2327_s25 = sshll.u32 %s2016_s16, 3 }
 0x126   : > { %v706_v43 = vadd.f32 %v705_v35, %v2922_v22  ;;  %s2018_s30 = scalar_lea.hbm %s3331_s6, %s2327_s25  ;;  %s2462_s25 = scalar_lea.hbm %s3331_s6, 576 }
 0x127   : > { %v813_v58 = vpop.f32.mrf.mxu2  ;;  %s2021_s24 = sshll.u32 %s2018_s30, 4  ;;  %s2022_s24 = int_to_ptr.hbm [resolvable:$true] %s2021_s24 }
 0x128   : > { %v846_v28 = vadd.f32 %v813_v58, %v704_v52  ;;  %2312 = vmatmul.msk.bf16.gmra.mxu3 %vm567_vm3, %v1621_v34  ;;  %v1452_v52 = vrot.slane %v3069_v55, 2  ;;  %v1634_v58 = vrot.slane %v1632_v25, 2  ;;  %s2456_s8 = sshra.s32 %s2022_s24, 4  ;;  %s2457_s8 = int_to_ptr.hbm [resolvable:$true] %s2456_s8 }
 0x129   : > { %2322 = vmatmul.msk.bf16.gmra.mxu0 %vm567_vm3, %v1777_v7  ;;  %s2458_s29 = scalar_lea.hbm %s2457_s8, 144  ;;  %p2463_p6 = scmp.lt.s32.totalorder %s2457_s8, %s3331_s6 }
 0x12a   : > { %v1036_v50 = vadd.f32 %v1003_v31, %v846_v28  ;;  %v1629_v31 = vor.u32 %v1628_v3, %v1625_v48  ;;  %v3115_v3 = vld [vmem:[#allocation2 + $0x50] sm:$0xff]  ;;  %p2459_p2 = scmp.ne.s32.totalorder %s2457_s8, %s2458_s29  ;;  %p2464_p7 = scmp.lt.s32.totalorder %s2462_s25, %s2458_s29 }
 0x12b   : > { %v1008_v62 = vpop.f32.mrf.mxu3  ;;  %v1644_v7 = vshll.u32 %v3115_v3, 16 }
 0x12c   : > { %v3077_v10 = vadd.f32 %v1201_v40, %v1036_v50  ;;  %v1630_v1 = vsel %vm1568_vm6, %v1620_v46, %v1629_v31  ;;  %v1208_v38 = vpop.f32.mrf.mxu0  ;;  %v1262_v40 = vrot.slane %v2878_v53, 2  ;;  %v1778_v46 = vrot.slane %v3069_v55, 3  ;;  %p2460_p4 = pnand %p2459_p2, %p2626_p3  ;;  %p2465_p9 = por %p2464_p7, %p2463_p6 }
 0x12d   : > { %v708_v57 = vpop.f32.mrf.mxu1  ;;  %v1637_v53 = vrot.slane %v1635_v41, 3 }
 0x12e   : > { %v709_v11 = vadd.f32 %v708_v57, %v2938_v54  ;;  %v1263_v34 = vsel %vm1250_vm7, %v1260_v12, %v1262_v40  ;;  %v1779_v30 = vsel %vm1766_vm8, %v1776_v8, %v1778_v46  ;;  %p2461_p5 = pneg %p2460_p4 }
 0x12f   : > { %v815_v0 = vpop.f32.mrf.mxu2  ;;  %v1638_v57 = vor.u32 %v1637_v53, %v1634_v58 }
 0x130   : > { %v847_v19 = vadd.f32 %v815_v0, %v706_v43  ;;  %2260 = vmatmul.msk.bf16.gmra.mxu1 %vm567_vm3, %v1261_v13  ;;  %p2466_p10 = pnand %p2465_p9, %p2461_p5 }
 0x132   : > { %v1037_v9 = vadd.f32 %v1005_v63, %v847_v19 }
 0x133   : > { %v1010_v33 = vpop.f32.mrf.mxu3 }
 0x134   : > { %2302 = vmatmul.msk.bf16.gmra.mxu2 %vm567_vm3, %v1451_v20  ;;  %v3089_v22 = vadd.f32 %v1203_v59, %v1037_v9  ;;  %v1211_v45 = vpop.f32.mrf.mxu0  ;;  %v1780_v9 = vrot.slane %v3092_v24, 3 }
 0x135   : > { %v710_v32 = vpop.f32.mrf.mxu1 }
 0x136   : > { %v711_v59 = vadd.f32 %v710_v32, %v2946_v47  ;;  %v1639_v47 = vsel %vm1568_vm6, %v1629_v31, %v1638_v57  ;;  %v1454_v32 = vrot.slane %v3092_v24, 2  ;;  %v1781_v25 = vsel %vm1766_vm8, %v1778_v46, %v1780_v9 }
 0x137   : > { %v818_v18 = vpop.f32.mrf.mxu2 }
 0x138   : > { %v848_v17 = vadd.f32 %v818_v18, %v709_v11  ;;  %2313 = vmatmul.msk.bf16.gmra.mxu3 %vm567_vm3, %v1630_v1  ;;  %v1646_v11 = vrot.slane %v1644_v7, 3 }
 0x139   : > { %2323 = vmatmul.msk.bf16.gmra.mxu0 %vm567_vm3, %v1779_v30 }
 0x13a   : > { %v1038_v5 = vadd.f32 %v1008_v62, %v848_v17  ;;  %v1453_v62 = vsel %vm1250_vm7, %v1450_v14, %v1452_v52  ;;  %v1264_v14 = vrot.slane %v2896_v2, 2  ;;  %v1562_v2 = vld [vmem:[#allocation2 + $0x58] sm:$0x7] }
 0x13b   : > { %v1013_v63 = vpop.f32.mrf.mxu3 }
 0x13c   : > { %v3102_v35 = vadd.f32 %v1206_v26, %v1038_v5  ;;  %v1213_v43 = vpop.f32.mrf.mxu0  ;;  %v1641_v26 = vshrl.u32 %v3115_v3, 16  ;;  %v1455_v5 = vsel %vm1250_vm7, %v1452_v52, %v1454_v32  ;;  %v1266_v52 = vrot.slane %v2920_v21, 2 }
 0x13d   : > { %v713_v54 = vpop.f32.mrf.mxu1 }
 0x13e   : > { %v714_v8 = vadd.f32 %v713_v54, %v2967_v6  ;;  %v1265_v6 = vsel %vm1250_vm7, %v1262_v40, %v1264_v14  ;;  %v1643_v1 = vrot.slane %v1641_v26, 2 }
 0x13f   : > { %v820_v28 = vpop.f32.mrf.mxu2 }
 0x140   : > { %v849_v50 = vadd.f32 %v820_v28, %v711_v59  ;;  %2261 = vmatmul.msk.bf16.gmra.mxu1 %vm567_vm3, %v1263_v34  ;;  %v1647_v51 = vor.u32 %v1646_v11, %v1643_v1 }
 0x142   : > { %v1039_v13 = vadd.f32 %v1010_v33, %v849_v50  ;;  %v1648_v34 = vsel %vm1568_vm6, %v1638_v57, %v1647_v51  ;;  %v1267_v57 = vsel %vm1250_vm7, %v1264_v14, %v1266_v52  ;;  %v1390_v14 = vld [vmem:[#allocation2 + $0x58] sm:$0x3] }
 0x143   : > { %v1015_v12 = vpop.f32.mrf.mxu3  ;;  %v1430_v1 = vunpack.c.l.b16 %v1390_v14 }
 0x144   : > { %2303 = vmatmul.msk.bf16.gmra.mxu2 %vm567_vm3, %v1453_v62  ;;  %v3112_v55 = vadd.f32 %v1208_v38, %v1039_v13  ;;  %v1216_v17 = vpop.f32.mrf.mxu0  ;;  %v1782_v13 = vrot.slane %v3115_v3, 3 }
 0x145   : > { %v715_v48 = vpop.f32.mrf.mxu1 }
 0x146   : > { %v716_v18 = vadd.f32 %v715_v48, %v2975_v23  ;;  %v1783_v21 = vsel %vm1766_vm8, %v1780_v9, %v1782_v13 }
 0x147   : > { %v823_v16 = vpop.f32.mrf.mxu2 }
 0x148   : > { %v850_v0 = vadd.f32 %v823_v16, %v714_v8  ;;  %2314 = vmatmul.msk.bf16.gmra.mxu3 %vm567_vm3, %v1639_v47 }
 0x149   : > { %2324 = vmatmul.msk.bf16.gmra.mxu0 %vm567_vm3, %v1781_v25 }
 0x14a   : > { %v1040_v19 = vadd.f32 %v1013_v63, %v850_v0  ;;  %v1566_v63 = vunpack.c.l.b16 %v1562_v2 }
 0x14b   : > { %v1018_v20 = vpop.f32.mrf.mxu3 }
 0x14c   : > { %v3123_v31 = vadd.f32 %v1211_v45, %v1040_v19  ;;  %v1567_v58 = vpack.c.b16 %v1566_v63, %v1566_v63  ;;  %v1218_v59 = vpop.f32.mrf.mxu0 }
 0x14d   : > { %v718_v33 = vpop.f32.mrf.mxu1 }
 0x14e   : > { %v719_v46 = vadd.f32 %v718_v33, %v2915_v15  ;;  %v1650_v45 = vshrl.u32 %v1567_v58, 16  ;;  %v1653_v30 = vshll.u32 %v1567_v58, 16  ;;  %v1456_v15 = vrot.slane %v3115_v3, 2 }
 0x14f   : > { %v825_v38 = vpop.f32.mrf.mxu2 }
 0x150   : > { %v851_v41 = vadd.f32 %v825_v38, %v716_v18  ;;  %2262 = vmatmul.msk.bf16.gmra.mxu1 %vm567_vm3, %v1265_v6  ;;  %v1652_v47 = vrot.slane %v1650_v45, 2  ;;  %v1655_v8 = vrot.slane %v1653_v30, 3  ;;  %v1457_v7 = vsel %vm1250_vm7, %v1454_v32, %v1456_v15 }
 0x151   : > { %v1268_v32 = vrot.slane %v2949_v56, 2  ;;  %v1440_v38 = vpack.c.b16 %v1430_v1, %v1430_v1 }
 0x152   : > { %v1041_v54 = vadd.f32 %v1015_v12, %v851_v41  ;;  %v1656_v19 = vor.u32 %v1655_v8, %v1652_v47  ;;  %v1784_v41 = vrot.slane %v1567_v58, 3 }
 0x153   : > { %v1020_v24 = vpop.f32.mrf.mxu3 }
 0x154   : > { %2304 = vmatmul.msk.bf16.gmra.mxu2 %vm567_vm3, %v1455_v5  ;;  %v3133_v40 = vadd.f32 %v1213_v43, %v1041_v54  ;;  %v1221_v0 = vpop.f32.mrf.mxu0  ;;  %v1657_v6 = vsel %vm1568_vm6, %v1647_v51, %v1656_v19  ;;  %v1269_v51 = vsel %vm1250_vm7, %v1266_v52, %v1268_v32  ;;  %v1458_v54 = vrot.slane %v1440_v38, 2 }
 0x155   : > { %v720_v23 = vpop.f32.mrf.mxu1 }
 0x156   : > { %v721_v16 = vadd.f32 %v720_v23, %v2930_v29  ;;  %v1459_v56 = vsel %vm1250_vm7, %v1456_v15, %v1458_v54 }
 0x157   : > { %v828_v53 = vpop.f32.mrf.mxu2 }
 0x158   : > { %v852_v28 = vadd.f32 %v828_v53, %v719_v46  ;;  %2315 = vmatmul.msk.bf16.gmra.mxu3 %vm567_vm3, %v1648_v34  ;;  %v1785_v34 = vsel %vm1766_vm8, %v1782_v13, %v1784_v41 }
 0x159   : > { %2325 = vmatmul.msk.bf16.gmra.mxu0 %vm567_vm3, %v1783_v21  ;;  %v1950_v21 = vld [vmem:[%s3184_s13] sm:$0xff] }
 0x15a   : > { %v1042_v50 = vadd.f32 %v1018_v20, %v852_v28 }
 0x15b   : > { %v1023_v62 = vpop.f32.mrf.mxu3 }
 0x15c   : > { %v3140_v12 = vadd.f32 %v1216_v17, %v1042_v50  ;;  %v1223_v18 = vpop.f32.mrf.mxu0 }
 0x15d   : > { %v723_v48 = vpop.f32.mrf.mxu1 }
 0x15e   : > { %v724_v9 = vadd.f32 %v723_v48, %v2941_v37 }
 0x15f   : > { %v830_v43 = vpop.f32.mrf.mxu2 }
 0x160   : > { %v853_v26 = vadd.f32 %v830_v43, %v721_v16  ;;  %2263 = vmatmul.msk.bf16.gmra.mxu1 %vm567_vm3, %v1267_v57  ;;  %v3179_v57 = vld [vmem:[%s3329_s4] ss:$0 sm:$0xff] }
 0x162   : > { %v1043_v20 = vadd.f32 %v1020_v24, %v853_v26 }
 0x163   : > { %v1025_v33 = vpop.f32.mrf.mxu3 }
 0x164   : > { %2305 = vmatmul.msk.bf16.gmra.mxu2 %vm567_vm3, %v1457_v7  ;;  %v3150_v3 = vadd.f32 %v1218_v59, %v1043_v20 }
 0x165   : > { %v725_v29 = vpop.f32.mrf.mxu1 }
 0x166   : > { %v726_v37 = vadd.f32 %v725_v29, %v2955_v61  ;;  %v1825_v23 = vpop.f32.mrf.mxu0 }
 0x167   : > { %v833_v11 = vpop.f32.mrf.mxu2 }
 0x168   : > { %v854_v2 = vadd.f32 %v833_v11, %v724_v9  ;;  %2316 = vmatmul.msk.bf16.gmra.mxu3 %vm567_vm3, %v1657_v6 }
 0x169   : > { %2326 = vmatmul.msk.bf16.gmra.mxu0 %vm567_vm3, %v1785_v34 }
 0x16a   : > { %v1044_v17 = vadd.f32 %v1023_v62, %v854_v2  ;;  %v3173_v62 = vld [vmem:[%s3328_s3] ss:$0 sm:$0xff] }
 0x16b   : > { %v1697_v25 = vpop.f32.mrf.mxu3 }
 0x16c   : > { %v3156_v5 = vadd.f32 %v1221_v0, %v1044_v17 }
 0x16d   : > { %v1309_v63 = vpop.f32.mrf.mxu1 }
 0x16e   : > { %v1354_v28 = vadd.f32 %v1309_v63, %v2994_v60  ;;  %v1827_v45 = vpop.f32.mrf.mxu0 }
 0x16f   : > { %v835_v24 = vpop.f32.mrf.mxu2 }
 0x170   : > { %v855_v46 = vadd.f32 %v835_v24, %v726_v37  ;;  %2264 = vmatmul.msk.bf16.gmra.mxu1 %vm567_vm3, %v1269_v51 }
 0x172   : > { %v1045_v53 = vadd.f32 %v1025_v33, %v855_v46 }
 0x173   : > { %v1699_v58 = vpop.f32.mrf.mxu3 }
 0x174   : > { %2306 = vmatmul.msk.bf16.gmra.mxu2 %vm567_vm3, %v1459_v56  ;;  %v3166_v59 = vadd.f32 %v1223_v18, %v1045_v53  ;;  %v1951_v18 = vld [vmem:[%s3184_s13 + $0x8] sm:$0xff] }
 0x175   : > { %v1311_v61 = vpop.f32.mrf.mxu1 }
 0x176   : > { %v1355_v47 = vadd.f32 %v1311_v61, %v3004_v39  ;;  %v1830_v16 = vpop.f32.mrf.mxu0 }
 0x177   : > { %v1499_v52 = vpop.f32.mrf.mxu2 }
 0x178   : > { %v1544_v30 = vadd.f32 %v1499_v52, %v1354_v28 }
 0x17a   : > { %v1742_v50 = vadd.f32 %v1697_v25, %v1544_v30 }
 0x17b   : > { %v1702_v13 = vpop.f32.mrf.mxu3 }
 0x17c   : > { %v1870_v48 = vadd.f32 %v1825_v23, %v1742_v50  ;;  %v1952_v23 = vld [vmem:[%s3184_s13 + $0x10] sm:$0xff] }
 0x17d   : > { %v1314_v60 = vpop.f32.mrf.mxu1 }
 0x17e   : > { %v1892_v15 = vmul.f32 %v3173_v62, %v1870_v48  ;;  %v1356_v29 = vadd.f32 %v1314_v60, %v3015_v4  ;;  %v1832_v1 = vpop.f32.mrf.mxu0 }
 0x17f   : > { %v1501_v8 = vpop.f32.mrf.mxu2 }
 0x180   : > { %v1914_v43 = vadd.f32 %v3179_v57, %v1892_v15  ;;  %v1545_v0 = vadd.f32 %v1501_v8, %v1355_v47 }
 0x182   : > { %v1932_v26 = vmax.f32 %v1914_v43, 0.0  ;;  %v1743_v7 = vadd.f32 %v1699_v58, %v1545_v0 }
 0x183   : > { %v1704_v19 = vpop.f32.mrf.mxu3 }
 0x184   : > { %v1968_v20 = vadd.f32 %v1950_v21, %v1932_v26  ;;  %v1871_v14 = vadd.f32 %v1827_v45, %v1743_v7 }
 0x185   : > { %v1316_v33 = vpop.f32.mrf.mxu1 }
 0x186   : > { %1986 = vst [vmem:[%s3192_s12] sm:$0xff] %v1968_v20  ;;  %v1893_v39 = vmul.f32 %v3173_v62, %v1871_v14  ;;  %v1357_v51 = vadd.f32 %v1316_v33, %v3025_v42  ;;  %v1835_v54 = vpop.f32.mrf.mxu0 }
 0x187   : > { %v1504_v6 = vpop.f32.mrf.mxu2 }
 0x188   : > { %v1915_v9 = vadd.f32 %v3179_v57, %v1893_v39  ;;  %v1546_v11 = vadd.f32 %v1504_v6, %v1356_v29 }
 0x18a   : > { %v1933_v2 = vmax.f32 %v1915_v9, 0.0  ;;  %v1744_v32 = vadd.f32 %v1702_v13, %v1546_v11  ;;  %v1953_v13 = vld [vmem:[%s3184_s13 + $0x18] sm:$0xff] }
 0x18b   : > { %v1707_v38 = vpop.f32.mrf.mxu3 }
 0x18c   : > { %v1969_v17 = vadd.f32 %v1951_v18, %v1933_v2  ;;  %v1872_v25 = vadd.f32 %v1830_v16, %v1744_v32  ;;  %v1955_v32 = vld [vmem:[%s3184_s13 + $0x28] sm:$0xff] }
 0x18d   : > { %v1319_v41 = vpop.f32.mrf.mxu1 }
 0x18e   : > { %1987 = vst [vmem:[%s3192_s12 + $0x8] sm:$0xff] %v1969_v17  ;;  %v1894_v63 = vmul.f32 %v3173_v62, %v1872_v25  ;;  %v1358_v52 = vadd.f32 %v1319_v41, %v3036_v44  ;;  %v1837_v45 = vpop.f32.mrf.mxu0 }
 0x18f   : > { %v1506_v4 = vpop.f32.mrf.mxu2 }
 0x190   : > { %v1916_v37 = vadd.f32 %v3179_v57, %v1894_v63  ;;  %v1547_v24 = vadd.f32 %v1506_v4, %v1357_v51 }
 0x192   : > { %v1934_v34 = vmax.f32 %v1916_v37, 0.0  ;;  %v1745_v46 = vadd.f32 %v1704_v19, %v1547_v24  ;;  %v1954_v19 = vld [vmem:[%s3184_s13 + $0x20] sm:$0xff] }
 0x193   : > { %v1709_v56 = vpop.f32.mrf.mxu3 }
 0x194   : > { %v1970_v53 = vadd.f32 %v1952_v23, %v1934_v34  ;;  %v1873_v58 = vadd.f32 %v1832_v1, %v1745_v46  ;;  %v1956_v34 = vld [vmem:[%s3184_s13 + $0x30] sm:$0xff] }
 0x195   : > { %v1321_v61 = vpop.f32.mrf.mxu1 }
 0x196   : > { %1988 = vst [vmem:[%s3192_s12 + $0x10] sm:$0xff] %v1970_v53  ;;  %v1895_v28 = vmul.f32 %v3173_v62, %v1873_v58  ;;  %v1359_v0 = vadd.f32 %v1321_v61, %v3046_v49  ;;  %v1840_v21 = vpop.f32.mrf.mxu0 }
 0x197   : > { %v1509_v42 = vpop.f32.mrf.mxu2 }
 0x198   : > { %v1917_v30 = vadd.f32 %v3179_v57, %v1895_v28  ;;  %v1548_v50 = vadd.f32 %v1509_v42, %v1358_v52 }
 0x19a   : > { %v1935_v48 = vmax.f32 %v1917_v30, 0.0  ;;  %v1746_v60 = vadd.f32 %v1707_v38, %v1548_v50 }
 0x19b   : > { %v1712_v15 = vpop.f32.mrf.mxu3 }
 0x19c   : > { %v1971_v47 = vadd.f32 %v1953_v13, %v1935_v48  ;;  %v1874_v8 = vadd.f32 %v1835_v54, %v1746_v60  ;;  %v1957_v13 = vld [vmem:[%s3184_s13 + $0x38] sm:$0xff] }
 0x19d   : > { %v1324_v16 = vpop.f32.mrf.mxu1 }
 0x19e   : > { %1989 = vst [vmem:[%s3192_s12 + $0x18] sm:$0xff] %v1971_v47  ;;  %v1896_v43 = vmul.f32 %v3173_v62, %v1874_v8  ;;  %v1360_v9 = vadd.f32 %v1324_v16, %v3057_v27  ;;  %v1842_v11 = vpop.f32.mrf.mxu0 }
 0x19f   : > { %v1511_v44 = vpop.f32.mrf.mxu2 }
 0x1a0   : > { %v1918_v26 = vadd.f32 %v3179_v57, %v1896_v43  ;;  %v1549_v7 = vadd.f32 %v1511_v44, %v1359_v0 }
 0x1a2   : > { %v1936_v20 = vmax.f32 %v1918_v26, 0.0  ;;  %v1747_v14 = vadd.f32 %v1709_v56, %v1549_v7  ;;  %v1958_v7 = vld [vmem:[%s3184_s13 + $0x40] sm:$0xff] }
 0x1a3   : > { %v1714_v33 = vpop.f32.mrf.mxu3 }
 0x1a4   : > { %v1972_v39 = vadd.f32 %v1954_v19, %v1936_v20  ;;  %v1875_v29 = vadd.f32 %v1837_v45, %v1747_v14 }
 0x1a5   : > { %v1326_v6 = vpop.f32.mrf.mxu1 }
 0x1a6   : > { %1990 = vst [vmem:[%s3192_s12 + $0x20] sm:$0xff] %v1972_v39  ;;  %v1897_v1 = vmul.f32 %v3173_v62, %v1875_v29  ;;  %v1361_v54 = vadd.f32 %v1326_v6, %v3066_v36  ;;  %v1845_v37 = vpop.f32.mrf.mxu0 }
 0x1a7   : > { %v1514_v49 = vpop.f32.mrf.mxu2 }
 0x1a8   : > { %v1919_v18 = vadd.f32 %v3179_v57, %v1897_v1  ;;  %v1550_v2 = vadd.f32 %v1514_v49, %v1360_v9 }
 0x1aa   : > { %v1937_v38 = vmax.f32 %v1919_v18, 0.0  ;;  %v1748_v17 = vadd.f32 %v1712_v15, %v1550_v2  ;;  %v1959_v18 = vld [vmem:[%s3184_s13 + $0x48] sm:$0xff] }
 0x1ab   : > { %v1717_v25 = vpop.f32.mrf.mxu3 }
 0x1ac   : > { %v1973_v41 = vadd.f32 %v1955_v32, %v1937_v38  ;;  %v1876_v63 = vadd.f32 %v1840_v21, %v1748_v17 }
 0x1ad   : > { %v1329_v51 = vpop.f32.mrf.mxu1 }
 0x1ae   : > { %1991 = vst [vmem:[%s3192_s12 + $0x28] sm:$0xff] %v1973_v41  ;;  %v1898_v4 = vmul.f32 %v3173_v62, %v1876_v63  ;;  %v1362_v42 = vadd.f32 %v1329_v51, %v3077_v10  ;;  %v1847_v45 = vpop.f32.mrf.mxu0 }
 0x1af   : > { %v1516_v27 = vpop.f32.mrf.mxu2 }
 0x1b0   : > { %v1920_v24 = vadd.f32 %v3179_v57, %v1898_v4  ;;  %v1551_v23 = vadd.f32 %v1516_v27, %v1361_v54  ;;  %v1960_v27 = vld [vmem:[%s3184_s13 + $0x50] sm:$0xff] }
 0x1b2   : > { %v1938_v46 = vmax.f32 %v1920_v24, 0.0  ;;  %v1749_v56 = vadd.f32 %v1714_v33, %v1551_v23 }
 0x1b3   : > { %v1719_v53 = vpop.f32.mrf.mxu3 }
 0x1b4   : > { %v1974_v58 = vadd.f32 %v1956_v34, %v1938_v46  ;;  %v1877_v61 = vadd.f32 %v1842_v11, %v1749_v56 }
 0x1b5   : > { %v1331_v28 = vpop.f32.mrf.mxu1 }
 0x1b6   : > { %1992 = vst [vmem:[%s3192_s12 + $0x30] sm:$0xff] %v1974_v58  ;;  %v1899_v52 = vmul.f32 %v3173_v62, %v1877_v61  ;;  %v1363_v0 = vadd.f32 %v1331_v28, %v3089_v22  ;;  %v1850_v44 = vpop.f32.mrf.mxu0 }
 0x1b7   : > { %v1519_v36 = vpop.f32.mrf.mxu2 }
 0x1b8   : > { %v1921_v30 = vadd.f32 %v3179_v57, %v1899_v52  ;;  %v1552_v50 = vadd.f32 %v1519_v36, %v1362_v42  ;;  %v1961_v52 = vld [vmem:[%s3184_s13 + $0x58] sm:$0xff] }
 0x1ba   : > { %v1939_v48 = vmax.f32 %v1921_v30, 0.0  ;;  %v1750_v60 = vadd.f32 %v1717_v25, %v1552_v50 }
 0x1bb   : > { %v1722_v15 = vpop.f32.mrf.mxu3 }
 0x1bc   : > { %v1975_v47 = vadd.f32 %v1957_v13, %v1939_v48  ;;  %v1878_v8 = vadd.f32 %v1845_v37, %v1750_v60 }
 0x1bd   : > { %v1334_v16 = vpop.f32.mrf.mxu1 }
 0x1be   : > { %1993 = vst [vmem:[%s3192_s12 + $0x38] sm:$0xff] %v1975_v47  ;;  %v1900_v43 = vmul.f32 %v3173_v62, %v1878_v8  ;;  %v1364_v1 = vadd.f32 %v1334_v16, %v3102_v35  ;;  %v1852_v9 = vpop.f32.mrf.mxu0  ;;  %v1962_v16 = vld [vmem:[%s3184_s13 + $0x60] sm:$0xff] }
 0x1bf   : > { %v1521_v10 = vpop.f32.mrf.mxu2 }
 0x1c0   : > { %v1922_v21 = vadd.f32 %v3179_v57, %v1900_v43  ;;  %v1553_v26 = vadd.f32 %v1521_v10, %v1363_v0 }
 0x1c2   : > { %v1940_v19 = vmax.f32 %v1922_v21, 0.0  ;;  %v1751_v20 = vadd.f32 %v1719_v53, %v1553_v26 }
 0x1c3   : > { %v1724_v29 = vpop.f32.mrf.mxu3 }
 0x1c4   : > { %v1976_v14 = vadd.f32 %v1958_v7, %v1940_v19  ;;  %v1879_v33 = vadd.f32 %v1847_v45, %v1751_v20 }
 0x1c5   : > { %v1336_v39 = vpop.f32.mrf.mxu1 }
 0x1c6   : > { %1994 = vst [vmem:[%s3192_s12 + $0x40] sm:$0xff] %v1976_v14  ;;  %v1901_v6 = vmul.f32 %v3173_v62, %v1879_v33  ;;  %v1365_v63 = vadd.f32 %v1336_v39, %v3112_v55  ;;  %v1855_v37 = vpop.f32.mrf.mxu0  ;;  %v1963_v39 = vld [vmem:[%s3184_s13 + $0x68] sm:$0xff] }
 0x1c7   : > { %v1524_v22 = vpop.f32.mrf.mxu2 }
 0x1c8   : > { %v1923_v49 = vadd.f32 %v3179_v57, %v1901_v6  ;;  %v1554_v11 = vadd.f32 %v1524_v22, %v1364_v1 }
 0x1ca   : > { %v1941_v2 = vmax.f32 %v1923_v49, 0.0  ;;  %v1752_v32 = vadd.f32 %v1722_v15, %v1554_v11 }
 0x1cb   : > { %v1727_v35 = vpop.f32.mrf.mxu3 }
 0x1cc   : > { %v1977_v38 = vadd.f32 %v1959_v18, %v1941_v2  ;;  %v1880_v17 = vadd.f32 %v1850_v44, %v1752_v32 }
 0x1cd   : > { %v1339_v25 = vpop.f32.mrf.mxu1 }
 0x1ce   : > { %1995 = vst [vmem:[%s3192_s12 + $0x48] sm:$0xff] %v1977_v38  ;;  %v1902_v41 = vmul.f32 %v3173_v62, %v1880_v17  ;;  %v1366_v58 = vadd.f32 %v1339_v25, %v3123_v31  ;;  %v1857_v30 = vpop.f32.mrf.mxu0  ;;  %v1964_v38 = vld [vmem:[%s3184_s13 + $0x70] sm:$0xff] }
 0x1cf   : > { %v1526_v51 = vpop.f32.mrf.mxu2 }
 0x1d0   : > { %v1924_v4 = vadd.f32 %v3179_v57, %v1902_v41  ;;  %v1555_v54 = vadd.f32 %v1526_v51, %v1365_v63 }
 0x1d2   : > { %v1942_v24 = vmax.f32 %v1924_v4, 0.0  ;;  %v1753_v23 = vadd.f32 %v1724_v29, %v1555_v54 }
 0x1d3   : > { %v1729_v42 = vpop.f32.mrf.mxu3 }
 0x1d4   : > { %v1978_v34 = vadd.f32 %v1960_v27, %v1942_v24  ;;  %v1881_v46 = vadd.f32 %v1852_v9, %v1753_v23  ;;  %v1965_v24 = vld [vmem:[%s3184_s13 + $0x78] sm:$0xff] }
 0x1d5   : > { %v1341_v56 = vpop.f32.mrf.mxu1 }
 0x1d6   : > { %1996 = vst [vmem:[%s3192_s12 + $0x50] sm:$0xff] %v1978_v34  ;;  %v1903_v53 = vmul.f32 %v3173_v62, %v1881_v46  ;;  %v1367_v15 = vadd.f32 %v1341_v56, %v3133_v40  ;;  %v1860_v26 = vpop.f32.mrf.mxu0 }
 0x1d7   : > { %v1529_v55 = vpop.f32.mrf.mxu2 }
 0x1d8   : > { %v1925_v61 = vadd.f32 %v3179_v57, %v1903_v53  ;;  %v1556_v28 = vadd.f32 %v1529_v55, %v1366_v58 }
 0x1da   : > { %v1943_v36 = vmax.f32 %v1925_v61, 0.0  ;;  %v1754_v45 = vadd.f32 %v1727_v35, %v1556_v28 }
 0x1db   : > { %v1732_v10 = vpop.f32.mrf.mxu3 }
 0x1dc   : > { %v1979_v50 = vadd.f32 %v1961_v52, %v1943_v36  ;;  %v1882_v13 = vadd.f32 %v1855_v37, %v1754_v45 }
 0x1dd   : > { %v1344_v48 = vpop.f32.mrf.mxu1 }
 0x1de   : > { %1997 = vst [vmem:[%s3192_s12 + $0x58] sm:$0xff] %v1979_v50  ;;  %v1904_v60 = vmul.f32 %v3173_v62, %v1882_v13  ;;  %v1368_v19 = vadd.f32 %v1344_v48, %v3140_v12  ;;  %v1862_v18 = vpop.f32.mrf.mxu0 }
 0x1df   : > { %v1531_v31 = vpop.f32.mrf.mxu2 }
 0x1e0   : > { %v1926_v47 = vadd.f32 %v3179_v57, %v1904_v60  ;;  %v1557_v8 = vadd.f32 %v1531_v31, %v1367_v15  ;;  %v1967_v15 = vld [vmem:[%s3184_s13 + $0x88] sm:$0xff] }
 0x1e2   : > { %v1944_v43 = vmax.f32 %v1926_v47, 0.0  ;;  %v1755_v0 = vadd.f32 %v1729_v42, %v1557_v8  ;;  %v1966_v42 = vld [vmem:[%s3184_s13 + $0x80] sm:$0xff] }
 0x1e3   : > { %v1734_v9 = vpop.f32.mrf.mxu3 }
 0x1e4   : > { %v1980_v44 = vadd.f32 %v1962_v16, %v1944_v43  ;;  %v1883_v21 = vadd.f32 %v1857_v30, %v1755_v0 }
 0x1e5   : > { %v1346_v40 = vpop.f32.mrf.mxu1 }
 0x1e6   : > { %1998 = vst [vmem:[%s3192_s12 + $0x60] sm:$0xff] %v1980_v44  ;;  %v1905_v7 = vmul.f32 %v3173_v62, %v1883_v21  ;;  %v1369_v11 = vadd.f32 %v1346_v40, %v3150_v3  ;;  %v1865_v23 = vpop.f32.mrf.mxu0 }
 0x1e7   : > { %v1534_v20 = vpop.f32.mrf.mxu2 }
 0x1e8   : > { %v1927_v14 = vadd.f32 %v3179_v57, %v1905_v7  ;;  %v1558_v33 = vadd.f32 %v1534_v20, %v1368_v19 }
 0x1ea   : > { %v1945_v29 = vmax.f32 %v1927_v14, 0.0  ;;  %v1756_v6 = vadd.f32 %v1732_v10, %v1558_v33 }
 0x1eb   : > { %v1737_v3 = vpop.f32.mrf.mxu3 }
 0x1ec   : > { %v1981_v1 = vadd.f32 %v1963_v39, %v1945_v29  ;;  %v1884_v22 = vadd.f32 %v1860_v26, %v1756_v6 }
 0x1ed   : > { %v1349_v17 = vpop.f32.mrf.mxu1 }
 0x1ee   : > { %1999 = vst [vmem:[%s3192_s12 + $0x68] sm:$0xff] %v1981_v1  ;;  %v1906_v49 = vmul.f32 %v3173_v62, %v1884_v22  ;;  %v1370_v4 = vadd.f32 %v1349_v17, %v3156_v5  ;;  %v1867_v50 = vpop.f32.mrf.mxu0 }
 0x1ef   : > { %v1536_v12 = vpop.f32.mrf.mxu2 }
 0x1f0   : > { %v1928_v2 = vadd.f32 %v3179_v57, %v1906_v49  ;;  %v1559_v32 = vadd.f32 %v1536_v12, %v1369_v11 }
 0x1f2   : > { %v1946_v25 = vmax.f32 %v1928_v2, 0.0  ;;  %v1757_v41 = vadd.f32 %v1734_v9, %v1559_v32 }
 0x1f3   : > { %v1739_v36 = vpop.f32.mrf.mxu3 }
 0x1f4   : > { %v1982_v63 = vadd.f32 %v1964_v38, %v1946_v25  ;;  %v1885_v51 = vadd.f32 %v1862_v18, %v1757_v41 }
 0x1f5   : > { %v1351_v56 = vpop.f32.mrf.mxu1 }
 0x1f6   : > { %2000 = vst [vmem:[%s3192_s12 + $0x70] sm:$0xff] %v1982_v63  ;;  %v1907_v35 = vmul.f32 %v3173_v62, %v1885_v51  ;;  %v1371_v5 = vadd.f32 %v1351_v56, %v3166_v59 }
 0x1f7   : > { %v1539_v54 = vpop.f32.mrf.mxu2 }
 0x1f8   : > { %v1929_v27 = vadd.f32 %v3179_v57, %v1907_v35  ;;  %v1560_v37 = vadd.f32 %v1539_v54, %v1370_v4 }
 0x1fa   : > { %v1947_v34 = vmax.f32 %v1929_v27, 0.0  ;;  %v1758_v46 = vadd.f32 %v1737_v3, %v1560_v37 }
 0x1fc   : > { %v1983_v53 = vadd.f32 %v1965_v24, %v1947_v34  ;;  %v1886_v58 = vadd.f32 %v1865_v23, %v1758_v46 }
 0x1fe   : > { %2001 = vst [vmem:[%s3192_s12 + $0x78] sm:$0xff] %v1983_v53  ;;  %v1908_v55 = vmul.f32 %v3173_v62, %v1886_v58 }
 0x1ff   : > { %v1541_v61 = vpop.f32.mrf.mxu2 }
 0x200   : > { %v1930_v28 = vadd.f32 %v3179_v57, %v1908_v55  ;;  %v1561_v52 = vadd.f32 %v1541_v61, %v1371_v5 }
 0x202   : > { %v1948_v45 = vmax.f32 %v1930_v28, 0.0  ;;  %v1759_v30 = vadd.f32 %v1739_v36, %v1561_v52 }
 0x204   : > { %v1984_v13 = vadd.f32 %v1966_v42, %v1948_v45  ;;  %v1887_v48 = vadd.f32 %v1867_v50, %v1759_v30 }
 0x206   : > { %2002 = vst [vmem:[%s3192_s12 + $0x80] sm:$0xff] %v1984_v13  ;;  %v1909_v59 = vmul.f32 %v3173_v62, %v1887_v48 }
 0x208   : > { %v1931_v60 = vadd.f32 %v3179_v57, %v1909_v59 }
 0x20a   : > { %v1949_v31 = vmax.f32 %v1931_v60, 0.0 }
 0x20c   : > { %v1985_v47 = vadd.f32 %v1967_v15, %v1949_v31 }
 0x20e   : > { %2003 = vst [vmem:[%s3192_s12 + $0x88] sm:$0xff] %v1985_v47 }
 0x20f   : > { %2469 = shalt.err (!%p2466_p10)
}
 0x210   : > { %s2538_s20 = smov 128   ;;  %s2539_s12 = smov 8  }
 0x211   : > { %2367 = dma.vmem_to_hbm [thread:$0]  (%p2626_p3), %s2020_s18, 2304, %s2022_s24, %s2005_s9, %s2538_s20, %s2538_s20, %s2539_s12  }
 0x212 PF: > { %p2373_p11 = scmp.ge.s32.totalorder %s2536_s28, 2  ;;  %s2036_s19 = sand.u32 1, %s2508_s21  }
 0x213   : > { %s2037_s30 = scalar_lea.sflag [#allocation4], %s2036_s19 }
 0x214   : > { %p2370_p12 = pnand %p2373_p11, %p2635_p8 }
 0x216   : > { %p2371_p13 = pneg %p2370_p12 }
 0x218   : > { %2503 = dma.done.wait (%p2371_p13), %s2037_s30, 2304  }
 0x219   : > { %2505 = vsyncadd (%p2371_p13), %s2037_s30, 4294964992  ;;  %s19_s28 = sadd.s32 1, %s2536_s28   ;;  %s3336_s10 = sld [smem:[#allocation6_spill]] }
 0x21a   : > { %p16_p0 = scmp.ge.s32.totalorder %s19_s28, 6   ;;  %s3337_s21 = smov %s2512_s22 }
 0x21b   : > { %s3338_s22 = smov %s2516_s23  ;;  %s3339_s23 = smov %s2644_s15 }
 0x21c   : > { %s3340_s24 = smov %s2528_s26  ;;  %s3341_s25 = smov %s2532_s27 }
 0x21d   : > { %s3342_s26 = smov %s3345_s7  ;;  %18 = sbr.rel (!%p16_p0) target bundleno = 5 (0x5), region = 93 }
 0x21f   : > { %s3343_s27 = smov %s3336_s10 }
 0x222   :  { %2043 = vsyncpa [#allocation4], 1 }
 0x223   :  { %2045 = vsyncpa [#allocation4 + $0x1], 1 }

</bundles_post_ra>
